<compile_context>
chip_gen: v5e
topology: v5e:2x2
jax: 0.10.0
libtpu: 0.0.40
codegen_flags: <defaults>
</compile_context>

<pallas_src>
import jax
import jax.numpy as jnp
from jax import lax
from jax.experimental import pallas as pl
from jax.experimental.pallas import tpu as pltpu


def vanilla_lstm_kernel(seq_ref,        # (T, tn, F)   observed sequence tile
                        prev0_ref,      # (tn, FP)     last observed frame, zero-padded
                        w_in_enc_ref,   # (F, 4H)      folded encoder input projection
                        w_hh_enc_ref,   # (H, 4H)
                        b_enc_ref,      # (1, 4H)      folded encoder bias
                        w_gate_dec_ref, # (FP+H, 4H)   stacked [input_pad; hidden] decoder weights
                        b_dec_ref,      # (1, 4H)      folded decoder bias
                        w_out_ref,      # (H, FP)      output head, lane-padded
                        b_out_ref,      # (1, FP)
                        out_ref):       # (P, tn, FP)
    T = seq_ref.shape[0]
    P = out_ref.shape[0]
    tn = seq_ref.shape[1]
    F = seq_ref.shape[2]
    H = w_hh_enc_ref.shape[0]

    # Hoist all weights out of the time loops (a few dozen vregs total).
    w_in_enc = w_in_enc_ref[...]
    w_hh_enc = w_hh_enc_ref[...]
    b_enc = b_enc_ref[...]
    w_gate_dec = w_gate_dec_ref[...]
    b_dec = b_dec_ref[...]
    w_out = w_out_ref[...]
    b_out = b_out_ref[...]

    # All four gate nonlinearities in a single EUP tanh pass over (tn, 4H):
    #   sigmoid(x) = 0.5 * tanh(0.5 x) + 0.5   for the i / f / o gate blocks,
    #   tanh(x)                                for the g (cell) block.
    col = lax.broadcasted_iota(jnp.int32, (1, 4 * H), 1)
    is_g = jnp.logical_and(col >= 2 * H, col < 3 * H)
    pre = jnp.where(is_g, 1.0, 0.5).astype(jnp.float32)   # also the post-scale
    post = jnp.where(is_g, 0.0, 0.5).astype(jnp.float32)

    def lstm_cell(gates, c):
        act = jnp.tanh(gates * pre) * pre + post
        i = act[:, 0:H]
        f = act[:, H:2 * H]
        g = act[:, 2 * H:3 * H]
        o = act[:, 3 * H:4 * H]
        c_new = f * c + i * g
        h_new = o * jnp.tanh(c_new)
        return h_new, c_new

    h = jnp.zeros((tn, H), jnp.float32)
    c = jnp.zeros((tn, H), jnp.float32)

    # ---- encoder ----
    # All T input projections in ONE matmul (bias folded in); the sequential
    # loop only carries the recurrent hidden matmul.
    seq_flat = seq_ref[...].reshape(T * tn, F)
    x_proj = jnp.dot(seq_flat, w_in_enc,
                     preferred_element_type=jnp.float32) + b_enc   # (T*tn, 4H)
    for t in range(T):                                             # fully unrolled
        gates = (x_proj[t * tn:(t + 1) * tn, :]
                 + jnp.dot(h, w_hh_enc, preferred_element_type=jnp.float32))
        h, c = lstm_cell(gates, c)

    # ---- decoder: keep encoder hidden, re-init cell, autoregressive roll-out ----
    c = jnp.zeros((tn, H), jnp.float32)
    prev = prev0_ref[...]                                   # (tn, FP), lane-dense
    for t in range(P):                                      # fully unrolled
        xh = jnp.concatenate([prev, h], axis=-1)            # (tn, FP + H), 128-aligned concat
        gates = jnp.dot(xh, w_gate_dec,
                        preferred_element_type=jnp.float32) + b_dec
        h, c = lstm_cell(gates, c)
        pred = jnp.tanh(jnp.dot(h, w_out,
                                preferred_element_type=jnp.float32) + b_out)
        out_ref[t] = pred                                   # full 128-lane store
        prev = pred                                         # padded lanes are exactly 0


def vanilla_lstm_forward(params, sequence, dist_matrix, bearing_matrix,
                         heading_matrix, seq_mask, op_mask, prediction_length):
    """sequence: (B, Ped, T, F) -> returns ((B, Ped, P, F), alignmentVector={})."""
    # The matrices / masks never enter the math of the reference forward.
    del dist_matrix, bearing_matrix, heading_matrix, seq_mask, op_mask
    B, Ped, T, F = sequence.shape
    N = B * Ped
    H = params["w_hh_enc"].shape[0]
    G = 4 * H
    FP = 128    # lane-dense padded feature width for decoder feedback / output

    seq_tnf = jnp.transpose(sequence, (2, 0, 1, 3)).reshape(T, N, F).astype(jnp.float32)

    # ---- fold the (dropout=0) embedding Linear into the LSTM input projection ----
    w_in_enc = params["w_emb_enc"] @ params["w_ih_enc"]                     # (F, 4H)
    b_enc = params["b_emb_enc"] @ params["w_ih_enc"] + params["b_enc"]      # (1, 4H)
    w_in_dec = params["w_emb_dec"] @ params["w_ih_dec"]                     # (F, 4H)
    b_dec = params["b_emb_dec"] @ params["w_ih_dec"] + params["b_dec"]      # (1, 4H)

    # ---- stack decoder [input; hidden] weights for one fused gate matmul.
    # Input rows padded to FP so the lane-dense padded prediction feeds back
    # directly (padded rows are zero -> no contribution).
    w_in_dec_pad = jnp.zeros((FP, G), jnp.float32).at[:F].set(w_in_dec)
    w_gate_dec = jnp.concatenate([w_in_dec_pad, params["w_hh_dec"]], axis=0)  # (FP+H, 4H)

    # ---- lane-dense output head (zero columns beyond F) ----
    w_out_pad = jnp.zeros((H, FP), jnp.float32).at[:, :F].set(params["w_out"])
    b_out_pad = jnp.zeros((1, FP), jnp.float32).at[:, :F].set(params["b_out"])

    # Decoder's first input: last observed frame, zero-padded to FP lanes.
    prev0 = jnp.zeros((N, FP), jnp.float32).at[:, :F].set(seq_tnf[T - 1])

    # ---- tile the flattened batch*ped axis (embarrassingly parallel) ----
    tn = N
    for cand in (512, 256, 128, 64, 32, 16, 8):
        if N >= cand and N % cand == 0:
            tn = cand
            break
    grid = (N // tn,)

    out = pl.pallas_call(
        vanilla_lstm_kernel,
        out_shape=jax.ShapeDtypeStruct((prediction_length, N, FP), jnp.float32),
        grid_spec=pltpu.PrefetchScalarGridSpec(
            num_scalar_prefetch=0,
            grid=grid,
            in_specs=[
                pl.BlockSpec((T, tn, F), lambda i: (0, i, 0)),        # sequence tile
                pl.BlockSpec((tn, FP), lambda i: (i, 0)),             # prev0 tile
                pl.BlockSpec((F, G), lambda i: (0, 0)),               # w_in_enc
                pl.BlockSpec((H, G), lambda i: (0, 0)),               # w_hh_enc
                pl.BlockSpec((1, G), lambda i: (0, 0)),               # b_enc
                pl.BlockSpec((FP + H, G), lambda i: (0, 0)),          # w_gate_dec
                pl.BlockSpec((1, G), lambda i: (0, 0)),               # b_dec
                pl.BlockSpec((H, FP), lambda i: (0, 0)),              # w_out
                pl.BlockSpec((1, FP), lambda i: (0, 0)),              # b_out
            ],
            out_specs=pl.BlockSpec((prediction_length, tn, FP),
                                   lambda i: (0, i, 0)),
        ),
        compiler_params=pltpu.CompilerParams(
            dimension_semantics=("parallel",),
            vmem_limit_bytes=64 << 20),
    )(seq_tnf, prev0, w_in_enc, params["w_hh_enc"], b_enc,
      w_gate_dec, b_dec, w_out_pad, b_out_pad)

    out = out[:, :, :F].reshape(prediction_length, B, Ped, F).transpose(1, 2, 0, 3)
    return out, {}


def reference_forward(params, sequence, prediction_length):
    """Pure-JAX reference with the original (unfused) parameterization."""
    B, Ped, T, F = sequence.shape
    N = B * Ped
    H = params["w_hh_enc"].shape[0]
    seq = jnp.transpose(sequence, (2, 0, 1, 3)).reshape(T, N, F)

    def cell(x, h, c, wih, whh, b):
        gates = x @ wih + h @ whh + b
        i = jax.nn.sigmoid(gates[:, :H])
        f = jax.nn.sigmoid(gates[:, H:2 * H])
        g = jnp.tanh(gates[:, 2 * H:3 * H])
        o = jax.nn.sigmoid(gates[:, 3 * H:])
        c = f * c + i * g
        h = o * jnp.tanh(c)
        return h, c

    h = jnp.zeros((N, H), jnp.float32)
    c = jnp.zeros((N, H), jnp.float32)
    for t in range(T):
        emb = seq[t] @ params["w_emb_enc"] + params["b_emb_enc"]
        h, c = cell(emb, h, c, params["w_ih_enc"], params["w_hh_enc"], params["b_enc"])
    prev = seq[T - 1]
    c = jnp.zeros((N, H), jnp.float32)
    outs = []
    for _ in range(prediction_length):
        emb = prev @ params["w_emb_dec"] + params["b_emb_dec"]
        h, c = cell(emb, h, c, params["w_ih_dec"], params["w_hh_dec"], params["b_dec"])
        pred = jnp.tanh(h @ params["w_out"] + params["b_out"])
        outs.append(pred)
        prev = pred
    out = jnp.stack(outs, 0).reshape(prediction_length, B, Ped, F).transpose(1, 2, 0, 3)
    return out


def init_params(key, feature_size, embedding_dim, hidden_dim):
    """Deterministic synthetic parameters (uniform in [-0.1, 0.1])."""
    ks = jax.random.split(key, 13)
    u = lambda k, shape: jax.random.uniform(k, shape, jnp.float32, -0.1, 0.1)
    F, E, H = feature_size, embedding_dim, hidden_dim
    return {
        "w_emb_enc": u(ks[0], (F, E)),   "b_emb_enc": u(ks[1], (1, E)),
        "w_ih_enc":  u(ks[2], (E, 4 * H)), "w_hh_enc": u(ks[3], (H, 4 * H)),
        "b_enc":     u(ks[4], (1, 4 * H)),  # = b_ih + b_hh folded together
        "w_emb_dec": u(ks[5], (F, E)),   "b_emb_dec": u(ks[6], (1, E)),
        "w_ih_dec":  u(ks[7], (E, 4 * H)), "w_hh_dec": u(ks[8], (H, 4 * H)),
        "b_dec":     u(ks[9], (1, 4 * H)),
        "w_out":     u(ks[10], (H, F)),  "b_out": u(ks[11], (1, F)),
    }


if __name__ == "__main__":
    # Small shapes consistent with the module: (batch, peds, seq_len, feature)
    batch_size = 2
    num_pedestrians = 4
    sequence_length = 8
    prediction_length = 8
    feature_size = 2
    embedding_dim = 32
    enc_dim = dec_dim = 32  # must be equal (original forward carries encoder h into decoder)

    key = jax.random.PRNGKey(0)
    k_par, k_seq, k_dist, k_bear, k_head = jax.random.split(key, 5)

    params = init_params(k_par, feature_size, embedding_dim, enc_dim)

    sequence = jax.random.normal(
        k_seq, (batch_size, num_pedestrians, sequence_length, feature_size), jnp.float32)
    dist_matrix = jax.random.normal(
        k_dist, (batch_size, num_pedestrians, sequence_length, num_pedestrians), jnp.float32)
    bearing_matrix = jax.random.normal(
        k_bear, (batch_size, num_pedestrians, sequence_length, num_pedestrians), jnp.float32)
    heading_matrix = jax.random.normal(
        k_head, (batch_size, num_pedestrians, sequence_length, num_pedestrians), jnp.float32)
    seq_mask = jnp.ones((batch_size, num_pedestrians, sequence_length), jnp.float32)
    op_mask = jnp.ones((batch_size, num_pedestrians), jnp.float32)

    out, alignment = vanilla_lstm_forward(
        params, sequence, dist_matrix, bearing_matrix, heading_matrix,
        seq_mask, op_mask, prediction_length)
    out = jax.block_until_ready(out)

    ref = reference_forward(params, sequence, prediction_length)
    assert out.shape == (batch_size, num_pedestrians, prediction_length, feature_size)
    assert isinstance(alignment, dict) and len(alignment) == 0
    assert jnp.allclose(out, ref, atol=1e-5, rtol=1e-5), "mismatch vs pure-JAX reference"

    print("KERNEL_OK")
</pallas_src>

<mosaic_0001>
module attributes {stable_mosaic.version = 11 : i64} {
  func.func @vanilla_lstm_kernel(%arg0: i32, %arg1: memref<8x8x2xf32, #tpu.memory_space<vmem>>, %arg2: memref<8x128xf32, #tpu.memory_space<vmem>>, %arg3: memref<2x128xf32, #tpu.memory_space<vmem>>, %arg4: memref<32x128xf32, #tpu.memory_space<vmem>>, %arg5: memref<1x128xf32, #tpu.memory_space<vmem>>, %arg6: memref<160x128xf32, #tpu.memory_space<vmem>>, %arg7: memref<1x128xf32, #tpu.memory_space<vmem>>, %arg8: memref<32x128xf32, #tpu.memory_space<vmem>>, %arg9: memref<1x128xf32, #tpu.memory_space<vmem>>, %arg10: memref<8x8x128xf32, #tpu.memory_space<vmem>>) attributes {dimension_semantics = [#tpu.dimension_semantics<parallel>], iteration_bounds = array<i64: 1>, scalar_prefetch = 0 : i64, scratch_operands = 0 : i64, tpu.core_type = #tpu.core_type<tc>, window_params = [{transform_indices = @transform_0, window_bounds = array<i64: 8, 8, 2>}, {transform_indices = @transform_1, window_bounds = array<i64: 8, 128>}, {pipeline_mode = #tpu.pipeline_mode<synchronous>, transform_indices = @transform_2, window_bounds = array<i64: 2, 128>}, {pipeline_mode = #tpu.pipeline_mode<synchronous>, transform_indices = @transform_3, window_bounds = array<i64: 32, 128>}, {pipeline_mode = #tpu.pipeline_mode<synchronous>, transform_indices = @transform_4, window_bounds = array<i64: 1, 128>}, {pipeline_mode = #tpu.pipeline_mode<synchronous>, transform_indices = @transform_5, window_bounds = array<i64: 160, 128>}, {pipeline_mode = #tpu.pipeline_mode<synchronous>, transform_indices = @transform_6, window_bounds = array<i64: 1, 128>}, {pipeline_mode = #tpu.pipeline_mode<synchronous>, transform_indices = @transform_7, window_bounds = array<i64: 32, 128>}, {pipeline_mode = #tpu.pipeline_mode<synchronous>, transform_indices = @transform_8, window_bounds = array<i64: 1, 128>}, {transform_indices = @transform_9, window_bounds = array<i64: 8, 8, 128>}]} {
    %c0 = arith.constant 0 : index
    %c0_0 = arith.constant 0 : index
    %0 = vector.load %arg3[%c0, %c0_0] : memref<2x128xf32, #tpu.memory_space<vmem>>, vector<2x128xf32>
    %c0_1 = arith.constant 0 : index
    %c0_2 = arith.constant 0 : index
    %1 = vector.load %arg4[%c0_1, %c0_2] : memref<32x128xf32, #tpu.memory_space<vmem>>, vector<32x128xf32>
    %c0_3 = arith.constant 0 : index
    %c0_4 = arith.constant 0 : index
    %2 = vector.load %arg5[%c0_3, %c0_4] : memref<1x128xf32, #tpu.memory_space<vmem>>, vector<1x128xf32>
    %c0_5 = arith.constant 0 : index
    %c0_6 = arith.constant 0 : index
    %3 = vector.load %arg6[%c0_5, %c0_6] : memref<160x128xf32, #tpu.memory_space<vmem>>, vector<160x128xf32>
    %c0_7 = arith.constant 0 : index
    %c0_8 = arith.constant 0 : index
    %4 = vector.load %arg7[%c0_7, %c0_8] : memref<1x128xf32, #tpu.memory_space<vmem>>, vector<1x128xf32>
    %c0_9 = arith.constant 0 : index
    %c0_10 = arith.constant 0 : index
    %5 = vector.load %arg8[%c0_9, %c0_10] : memref<32x128xf32, #tpu.memory_space<vmem>>, vector<32x128xf32>
    %c0_11 = arith.constant 0 : index
    %c0_12 = arith.constant 0 : index
    %6 = vector.load %arg9[%c0_11, %c0_12] : memref<1x128xf32, #tpu.memory_space<vmem>>, vector<1x128xf32>
    %7 = tpu.iota {dimensions = array<i32: 1>} : vector<1x128xi32>
    %c64_i32 = arith.constant 64 : i32
    %8 = vector.broadcast %c64_i32 : i32 to vector<1x128xi32>
    %9 = arith.cmpi sge, %7, %8 : vector<1x128xi32>
    %c96_i32 = arith.constant 96 : i32
    %10 = vector.broadcast %c96_i32 : i32 to vector<1x128xi32>
    %11 = arith.cmpi slt, %7, %10 : vector<1x128xi32>
    %12 = arith.andi %9, %11 : vector<1x128xi1>
    %cst = arith.constant 1.000000e+00 : f32
    %cst_13 = arith.constant 5.000000e-01 : f32
    %13 = vector.broadcast %cst : f32 to vector<1x128xf32>
    %14 = vector.broadcast %cst_13 : f32 to vector<1x128xf32>
    %15 = arith.select %12, %13, %14 : vector<1x128xi1>, vector<1x128xf32>
    %cst_14 = arith.constant 0.000000e+00 : f32
    %cst_15 = arith.constant 5.000000e-01 : f32
    %16 = vector.broadcast %cst_14 : f32 to vector<1x128xf32>
    %17 = vector.broadcast %cst_15 : f32 to vector<1x128xf32>
    %18 = arith.select %12, %16, %17 : vector<1x128xi1>, vector<1x128xf32>
    %cst_16 = arith.constant 0.000000e+00 : f32
    %19 = vector.broadcast %cst_16 : f32 to vector<8x32xf32>
    %cst_17 = arith.constant 0.000000e+00 : f32
    %20 = vector.broadcast %cst_17 : f32 to vector<8x32xf32>
    %c0_18 = arith.constant 0 : index
    %c0_19 = arith.constant 0 : index
    %c0_20 = arith.constant 0 : index
    %21 = vector.load %arg1[%c0_18, %c0_19, %c0_20] : memref<8x8x2xf32, #tpu.memory_space<vmem>>, vector<8x8x2xf32>
    %22 = vector.shape_cast %21 : vector<8x8x2xf32> to vector<64x2xf32>
    %cst_21 = arith.constant dense<0.000000e+00> : vector<64x128xf32>
    %23 = tpu.matmul %22, %0, %cst_21 {dimension_numbers = #tpu.dot_dimension_numbers<[1], [0], [0], [1], [0, 0, 1, 1], [], []>} : vector<64x2xf32>, vector<2x128xf32>, vector<64x128xf32> -> vector<64x128xf32>
    %24 = vector.broadcast %2 : vector<1x128xf32> to vector<64x128xf32>
    %25 = arith.addf %23, %24 : vector<64x128xf32>
    %26 = vector.extract_strided_slice %25 {offsets = [0, 0], sizes = [8, 128], strides = [1, 1]} : vector<64x128xf32> to vector<8x128xf32>
    %cst_22 = arith.constant dense<0.000000e+00> : vector<8x128xf32>
    %27 = tpu.matmul %19, %1, %cst_22 {dimension_numbers = #tpu.dot_dimension_numbers<[1], [0], [0], [1], [0, 0, 1, 1], [], []>} : vector<8x32xf32>, vector<32x128xf32>, vector<8x128xf32> -> vector<8x128xf32>
    %28 = arith.addf %26, %27 : vector<8x128xf32>
    %29 = vector.broadcast %15 : vector<1x128xf32> to vector<8x128xf32>
    %30 = arith.mulf %28, %29 : vector<8x128xf32>
    %31 = math.tanh %30 : vector<8x128xf32>
    %32 = vector.broadcast %15 : vector<1x128xf32> to vector<8x128xf32>
    %33 = arith.mulf %31, %32 : vector<8x128xf32>
    %34 = vector.broadcast %18 : vector<1x128xf32> to vector<8x128xf32>
    %35 = arith.addf %33, %34 : vector<8x128xf32>
    %36 = vector.extract_strided_slice %35 {offsets = [0, 0], sizes = [8, 32], strides = [1, 1]} : vector<8x128xf32> to vector<8x32xf32>
    %37 = vector.extract_strided_slice %35 {offsets = [0, 32], sizes = [8, 32], strides = [1, 1]} : vector<8x128xf32> to vector<8x32xf32>
    %38 = vector.extract_strided_slice %35 {offsets = [0, 64], sizes = [8, 32], strides = [1, 1]} : vector<8x128xf32> to vector<8x32xf32>
    %39 = vector.extract_strided_slice %35 {offsets = [0, 96], sizes = [8, 32], strides = [1, 1]} : vector<8x128xf32> to vector<8x32xf32>
    %40 = arith.mulf %37, %20 : vector<8x32xf32>
    %41 = arith.mulf %36, %38 : vector<8x32xf32>
    %42 = arith.addf %40, %41 : vector<8x32xf32>
    %43 = math.tanh %42 : vector<8x32xf32>
    %44 = arith.mulf %39, %43 : vector<8x32xf32>
    %45 = vector.extract_strided_slice %25 {offsets = [8, 0], sizes = [8, 128], strides = [1, 1]} : vector<64x128xf32> to vector<8x128xf32>
    %cst_23 = arith.constant dense<0.000000e+00> : vector<8x128xf32>
    %46 = tpu.matmul %44, %1, %cst_23 {dimension_numbers = #tpu.dot_dimension_numbers<[1], [0], [0], [1], [0, 0, 1, 1], [], []>} : vector<8x32xf32>, vector<32x128xf32>, vector<8x128xf32> -> vector<8x128xf32>
    %47 = arith.addf %45, %46 : vector<8x128xf32>
    %48 = vector.broadcast %15 : vector<1x128xf32> to vector<8x128xf32>
    %49 = arith.mulf %47, %48 : vector<8x128xf32>
    %50 = math.tanh %49 : vector<8x128xf32>
    %51 = vector.broadcast %15 : vector<1x128xf32> to vector<8x128xf32>
    %52 = arith.mulf %50, %51 : vector<8x128xf32>
    %53 = vector.broadcast %18 : vector<1x128xf32> to vector<8x128xf32>
    %54 = arith.addf %52, %53 : vector<8x128xf32>
    %55 = vector.extract_strided_slice %54 {offsets = [0, 0], sizes = [8, 32], strides = [1, 1]} : vector<8x128xf32> to vector<8x32xf32>
    %56 = vector.extract_strided_slice %54 {offsets = [0, 32], sizes = [8, 32], strides = [1, 1]} : vector<8x128xf32> to vector<8x32xf32>
    %57 = vector.extract_strided_slice %54 {offsets = [0, 64], sizes = [8, 32], strides = [1, 1]} : vector<8x128xf32> to vector<8x32xf32>
    %58 = vector.extract_strided_slice %54 {offsets = [0, 96], sizes = [8, 32], strides = [1, 1]} : vector<8x128xf32> to vector<8x32xf32>
    %59 = arith.mulf %56, %42 : vector<8x32xf32>
    %60 = arith.mulf %55, %57 : vector<8x32xf32>
    %61 = arith.addf %59, %60 : vector<8x32xf32>
    %62 = math.tanh %61 : vector<8x32xf32>
    %63 = arith.mulf %58, %62 : vector<8x32xf32>
    %64 = vector.extract_strided_slice %25 {offsets = [16, 0], sizes = [8, 128], strides = [1, 1]} : vector<64x128xf32> to vector<8x128xf32>
    %cst_24 = arith.constant dense<0.000000e+00> : vector<8x128xf32>
    %65 = tpu.matmul %63, %1, %cst_24 {dimension_numbers = #tpu.dot_dimension_numbers<[1], [0], [0], [1], [0, 0, 1, 1], [], []>} : vector<8x32xf32>, vector<32x128xf32>, vector<8x128xf32> -> vector<8x128xf32>
    %66 = arith.addf %64, %65 : vector<8x128xf32>
    %67 = vector.broadcast %15 : vector<1x128xf32> to vector<8x128xf32>
    %68 = arith.mulf %66, %67 : vector<8x128xf32>
    %69 = math.tanh %68 : vector<8x128xf32>
    %70 = vector.broadcast %15 : vector<1x128xf32> to vector<8x128xf32>
    %71 = arith.mulf %69, %70 : vector<8x128xf32>
    %72 = vector.broadcast %18 : vector<1x128xf32> to vector<8x128xf32>
    %73 = arith.addf %71, %72 : vector<8x128xf32>
    %74 = vector.extract_strided_slice %73 {offsets = [0, 0], sizes = [8, 32], strides = [1, 1]} : vector<8x128xf32> to vector<8x32xf32>
    %75 = vector.extract_strided_slice %73 {offsets = [0, 32], sizes = [8, 32], strides = [1, 1]} : vector<8x128xf32> to vector<8x32xf32>
    %76 = vector.extract_strided_slice %73 {offsets = [0, 64], sizes = [8, 32], strides = [1, 1]} : vector<8x128xf32> to vector<8x32xf32>
    %77 = vector.extract_strided_slice %73 {offsets = [0, 96], sizes = [8, 32], strides = [1, 1]} : vector<8x128xf32> to vector<8x32xf32>
    %78 = arith.mulf %75, %61 : vector<8x32xf32>
    %79 = arith.mulf %74, %76 : vector<8x32xf32>
    %80 = arith.addf %78, %79 : vector<8x32xf32>
    %81 = math.tanh %80 : vector<8x32xf32>
    %82 = arith.mulf %77, %81 : vector<8x32xf32>
    %83 = vector.extract_strided_slice %25 {offsets = [24, 0], sizes = [8, 128], strides = [1, 1]} : vector<64x128xf32> to vector<8x128xf32>
    %cst_25 = arith.constant dense<0.000000e+00> : vector<8x128xf32>
    %84 = tpu.matmul %82, %1, %cst_25 {dimension_numbers = #tpu.dot_dimension_numbers<[1], [0], [0], [1], [0, 0, 1, 1], [], []>} : vector<8x32xf32>, vector<32x128xf32>, vector<8x128xf32> -> vector<8x128xf32>
    %85 = arith.addf %83, %84 : vector<8x128xf32>
    %86 = vector.broadcast %15 : vector<1x128xf32> to vector<8x128xf32>
    %87 = arith.mulf %85, %86 : vector<8x128xf32>
    %88 = math.tanh %87 : vector<8x128xf32>
    %89 = vector.broadcast %15 : vector<1x128xf32> to vector<8x128xf32>
    %90 = arith.mulf %88, %89 : vector<8x128xf32>
    %91 = vector.broadcast %18 : vector<1x128xf32> to vector<8x128xf32>
    %92 = arith.addf %90, %91 : vector<8x128xf32>
    %93 = vector.extract_strided_slice %92 {offsets = [0, 0], sizes = [8, 32], strides = [1, 1]} : vector<8x128xf32> to vector<8x32xf32>
    %94 = vector.extract_strided_slice %92 {offsets = [0, 32], sizes = [8, 32], strides = [1, 1]} : vector<8x128xf32> to vector<8x32xf32>
    %95 = vector.extract_strided_slice %92 {offsets = [0, 64], sizes = [8, 32], strides = [1, 1]} : vector<8x128xf32> to vector<8x32xf32>
    %96 = vector.extract_strided_slice %92 {offsets = [0, 96], sizes = [8, 32], strides = [1, 1]} : vector<8x128xf32> to vector<8x32xf32>
    %97 = arith.mulf %94, %80 : vector<8x32xf32>
    %98 = arith.mulf %93, %95 : vector<8x32xf32>
    %99 = arith.addf %97, %98 : vector<8x32xf32>
    %100 = math.tanh %99 : vector<8x32xf32>
    %101 = arith.mulf %96, %100 : vector<8x32xf32>
    %102 = vector.extract_strided_slice %25 {offsets = [32, 0], sizes = [8, 128], strides = [1, 1]} : vector<64x128xf32> to vector<8x128xf32>
    %cst_26 = arith.constant dense<0.000000e+00> : vector<8x128xf32>
    %103 = tpu.matmul %101, %1, %cst_26 {dimension_numbers = #tpu.dot_dimension_numbers<[1], [0], [0], [1], [0, 0, 1, 1], [], []>} : vector<8x32xf32>, vector<32x128xf32>, vector<8x128xf32> -> vector<8x128xf32>
    %104 = arith.addf %102, %103 : vector<8x128xf32>
    %105 = vector.broadcast %15 : vector<1x128xf32> to vector<8x128xf32>
    %106 = arith.mulf %104, %105 : vector<8x128xf32>
    %107 = math.tanh %106 : vector<8x128xf32>
    %108 = vector.broadcast %15 : vector<1x128xf32> to vector<8x128xf32>
    %109 = arith.mulf %107, %108 : vector<8x128xf32>
    %110 = vector.broadcast %18 : vector<1x128xf32> to vector<8x128xf32>
    %111 = arith.addf %109, %110 : vector<8x128xf32>
    %112 = vector.extract_strided_slice %111 {offsets = [0, 0], sizes = [8, 32], strides = [1, 1]} : vector<8x128xf32> to vector<8x32xf32>
    %113 = vector.extract_strided_slice %111 {offsets = [0, 32], sizes = [8, 32], strides = [1, 1]} : vector<8x128xf32> to vector<8x32xf32>
    %114 = vector.extract_strided_slice %111 {offsets = [0, 64], sizes = [8, 32], strides = [1, 1]} : vector<8x128xf32> to vector<8x32xf32>
    %115 = vector.extract_strided_slice %111 {offsets = [0, 96], sizes = [8, 32], strides = [1, 1]} : vector<8x128xf32> to vector<8x32xf32>
    %116 = arith.mulf %113, %99 : vector<8x32xf32>
    %117 = arith.mulf %112, %114 : vector<8x32xf32>
    %118 = arith.addf %116, %117 : vector<8x32xf32>
    %119 = math.tanh %118 : vector<8x32xf32>
    %120 = arith.mulf %115, %119 : vector<8x32xf32>
    %121 = vector.extract_strided_slice %25 {offsets = [40, 0], sizes = [8, 128], strides = [1, 1]} : vector<64x128xf32> to vector<8x128xf32>
    %cst_27 = arith.constant dense<0.000000e+00> : vector<8x128xf32>
    %122 = tpu.matmul %120, %1, %cst_27 {dimension_numbers = #tpu.dot_dimension_numbers<[1], [0], [0], [1], [0, 0, 1, 1], [], []>} : vector<8x32xf32>, vector<32x128xf32>, vector<8x128xf32> -> vector<8x128xf32>
    %123 = arith.addf %121, %122 : vector<8x128xf32>
    %124 = vector.broadcast %15 : vector<1x128xf32> to vector<8x128xf32>
    %125 = arith.mulf %123, %124 : vector<8x128xf32>
    %126 = math.tanh %125 : vector<8x128xf32>
    %127 = vector.broadcast %15 : vector<1x128xf32> to vector<8x128xf32>
    %128 = arith.mulf %126, %127 : vector<8x128xf32>
    %129 = vector.broadcast %18 : vector<1x128xf32> to vector<8x128xf32>
    %130 = arith.addf %128, %129 : vector<8x128xf32>
    %131 = vector.extract_strided_slice %130 {offsets = [0, 0], sizes = [8, 32], strides = [1, 1]} : vector<8x128xf32> to vector<8x32xf32>
    %132 = vector.extract_strided_slice %130 {offsets = [0, 32], sizes = [8, 32], strides = [1, 1]} : vector<8x128xf32> to vector<8x32xf32>
    %133 = vector.extract_strided_slice %130 {offsets = [0, 64], sizes = [8, 32], strides = [1, 1]} : vector<8x128xf32> to vector<8x32xf32>
    %134 = vector.extract_strided_slice %130 {offsets = [0, 96], sizes = [8, 32], strides = [1, 1]} : vector<8x128xf32> to vector<8x32xf32>
    %135 = arith.mulf %132, %118 : vector<8x32xf32>
    %136 = arith.mulf %131, %133 : vector<8x32xf32>
    %137 = arith.addf %135, %136 : vector<8x32xf32>
    %138 = math.tanh %137 : vector<8x32xf32>
    %139 = arith.mulf %134, %138 : vector<8x32xf32>
    %140 = vector.extract_strided_slice %25 {offsets = [48, 0], sizes = [8, 128], strides = [1, 1]} : vector<64x128xf32> to vector<8x128xf32>
    %cst_28 = arith.constant dense<0.000000e+00> : vector<8x128xf32>
    %141 = tpu.matmul %139, %1, %cst_28 {dimension_numbers = #tpu.dot_dimension_numbers<[1], [0], [0], [1], [0, 0, 1, 1], [], []>} : vector<8x32xf32>, vector<32x128xf32>, vector<8x128xf32> -> vector<8x128xf32>
    %142 = arith.addf %140, %141 : vector<8x128xf32>
    %143 = vector.broadcast %15 : vector<1x128xf32> to vector<8x128xf32>
    %144 = arith.mulf %142, %143 : vector<8x128xf32>
    %145 = math.tanh %144 : vector<8x128xf32>
    %146 = vector.broadcast %15 : vector<1x128xf32> to vector<8x128xf32>
    %147 = arith.mulf %145, %146 : vector<8x128xf32>
    %148 = vector.broadcast %18 : vector<1x128xf32> to vector<8x128xf32>
    %149 = arith.addf %147, %148 : vector<8x128xf32>
    %150 = vector.extract_strided_slice %149 {offsets = [0, 0], sizes = [8, 32], strides = [1, 1]} : vector<8x128xf32> to vector<8x32xf32>
    %151 = vector.extract_strided_slice %149 {offsets = [0, 32], sizes = [8, 32], strides = [1, 1]} : vector<8x128xf32> to vector<8x32xf32>
    %152 = vector.extract_strided_slice %149 {offsets = [0, 64], sizes = [8, 32], strides = [1, 1]} : vector<8x128xf32> to vector<8x32xf32>
    %153 = vector.extract_strided_slice %149 {offsets = [0, 96], sizes = [8, 32], strides = [1, 1]} : vector<8x128xf32> to vector<8x32xf32>
    %154 = arith.mulf %151, %137 : vector<8x32xf32>
    %155 = arith.mulf %150, %152 : vector<8x32xf32>
    %156 = arith.addf %154, %155 : vector<8x32xf32>
    %157 = math.tanh %156 : vector<8x32xf32>
    %158 = arith.mulf %153, %157 : vector<8x32xf32>
    %159 = vector.extract_strided_slice %25 {offsets = [56, 0], sizes = [8, 128], strides = [1, 1]} : vector<64x128xf32> to vector<8x128xf32>
    %cst_29 = arith.constant dense<0.000000e+00> : vector<8x128xf32>
    %160 = tpu.matmul %158, %1, %cst_29 {dimension_numbers = #tpu.dot_dimension_numbers<[1], [0], [0], [1], [0, 0, 1, 1], [], []>} : vector<8x32xf32>, vector<32x128xf32>, vector<8x128xf32> -> vector<8x128xf32>
    %161 = arith.addf %159, %160 : vector<8x128xf32>
    %162 = vector.broadcast %15 : vector<1x128xf32> to vector<8x128xf32>
    %163 = arith.mulf %161, %162 : vector<8x128xf32>
    %164 = math.tanh %163 : vector<8x128xf32>
    %165 = vector.broadcast %15 : vector<1x128xf32> to vector<8x128xf32>
    %166 = arith.mulf %164, %165 : vector<8x128xf32>
    %167 = vector.broadcast %18 : vector<1x128xf32> to vector<8x128xf32>
    %168 = arith.addf %166, %167 : vector<8x128xf32>
    %169 = vector.extract_strided_slice %168 {offsets = [0, 0], sizes = [8, 32], strides = [1, 1]} : vector<8x128xf32> to vector<8x32xf32>
    %170 = vector.extract_strided_slice %168 {offsets = [0, 32], sizes = [8, 32], strides = [1, 1]} : vector<8x128xf32> to vector<8x32xf32>
    %171 = vector.extract_strided_slice %168 {offsets = [0, 64], sizes = [8, 32], strides = [1, 1]} : vector<8x128xf32> to vector<8x32xf32>
    %172 = vector.extract_strided_slice %168 {offsets = [0, 96], sizes = [8, 32], strides = [1, 1]} : vector<8x128xf32> to vector<8x32xf32>
    %173 = arith.mulf %170, %156 : vector<8x32xf32>
    %174 = arith.mulf %169, %171 : vector<8x32xf32>
    %175 = arith.addf %173, %174 : vector<8x32xf32>
    %176 = math.tanh %175 : vector<8x32xf32>
    %177 = arith.mulf %172, %176 : vector<8x32xf32>
    %cst_30 = arith.constant 0.000000e+00 : f32
    %178 = vector.broadcast %cst_30 : f32 to vector<8x32xf32>
    %c0_31 = arith.constant 0 : index
    %c0_32 = arith.constant 0 : index
    %179 = vector.load %arg2[%c0_31, %c0_32] : memref<8x128xf32, #tpu.memory_space<vmem>>, vector<8x128xf32>
    %180 = tpu.concatenate %179, %177 in 1 : vector<8x128xf32>, vector<8x32xf32> -> vector<8x160xf32>
    %cst_33 = arith.constant dense<0.000000e+00> : vector<8x128xf32>
    %181 = tpu.matmul %180, %3, %cst_33 {dimension_numbers = #tpu.dot_dimension_numbers<[1], [0], [0], [1], [0, 0, 1, 1], [], []>} : vector<8x160xf32>, vector<160x128xf32>, vector<8x128xf32> -> vector<8x128xf32>
    %182 = vector.broadcast %4 : vector<1x128xf32> to vector<8x128xf32>
    %183 = arith.addf %181, %182 : vector<8x128xf32>
    %184 = vector.broadcast %15 : vector<1x128xf32> to vector<8x128xf32>
    %185 = arith.mulf %183, %184 : vector<8x128xf32>
    %186 = math.tanh %185 : vector<8x128xf32>
    %187 = vector.broadcast %15 : vector<1x128xf32> to vector<8x128xf32>
    %188 = arith.mulf %186, %187 : vector<8x128xf32>
    %189 = vector.broadcast %18 : vector<1x128xf32> to vector<8x128xf32>
    %190 = arith.addf %188, %189 : vector<8x128xf32>
    %191 = vector.extract_strided_slice %190 {offsets = [0, 0], sizes = [8, 32], strides = [1, 1]} : vector<8x128xf32> to vector<8x32xf32>
    %192 = vector.extract_strided_slice %190 {offsets = [0, 32], sizes = [8, 32], strides = [1, 1]} : vector<8x128xf32> to vector<8x32xf32>
    %193 = vector.extract_strided_slice %190 {offsets = [0, 64], sizes = [8, 32], strides = [1, 1]} : vector<8x128xf32> to vector<8x32xf32>
    %194 = vector.extract_strided_slice %190 {offsets = [0, 96], sizes = [8, 32], strides = [1, 1]} : vector<8x128xf32> to vector<8x32xf32>
    %195 = arith.mulf %192, %178 : vector<8x32xf32>
    %196 = arith.mulf %191, %193 : vector<8x32xf32>
    %197 = arith.addf %195, %196 : vector<8x32xf32>
    %198 = math.tanh %197 : vector<8x32xf32>
    %199 = arith.mulf %194, %198 : vector<8x32xf32>
    %cst_34 = arith.constant dense<0.000000e+00> : vector<8x128xf32>
    %200 = tpu.matmul %199, %5, %cst_34 {dimension_numbers = #tpu.dot_dimension_numbers<[1], [0], [0], [1], [0, 0, 1, 1], [], []>} : vector<8x32xf32>, vector<32x128xf32>, vector<8x128xf32> -> vector<8x128xf32>
    %201 = vector.broadcast %6 : vector<1x128xf32> to vector<8x128xf32>
    %202 = arith.addf %200, %201 : vector<8x128xf32>
    %203 = math.tanh %202 : vector<8x128xf32>
    %c0_35 = arith.constant 0 : index
    %c0_36 = arith.constant 0 : index
    %c0_37 = arith.constant 0 : index
    %204 = vector.load %arg10[%c0_35, %c0_36, %c0_37] : memref<8x8x128xf32, #tpu.memory_space<vmem>>, vector<1x8x128xf32>
    %205 = vector.shape_cast %204 : vector<1x8x128xf32> to vector<8x128xf32>
    %206 = vector.shape_cast %203 : vector<8x128xf32> to vector<1x8x128xf32>
    tpu.vector_store %arg10[%c0_35, %c0_36, %c0_37], %206 {strides = array<i32>} : memref<8x8x128xf32, #tpu.memory_space<vmem>>, vector<1x8x128xf32>,
    %207 = tpu.concatenate %203, %199 in 1 : vector<8x128xf32>, vector<8x32xf32> -> vector<8x160xf32>
    %cst_38 = arith.constant dense<0.000000e+00> : vector<8x128xf32>
    %208 = tpu.matmul %207, %3, %cst_38 {dimension_numbers = #tpu.dot_dimension_numbers<[1], [0], [0], [1], [0, 0, 1, 1], [], []>} : vector<8x160xf32>, vector<160x128xf32>, vector<8x128xf32> -> vector<8x128xf32>
    %209 = vector.broadcast %4 : vector<1x128xf32> to vector<8x128xf32>
    %210 = arith.addf %208, %209 : vector<8x128xf32>
    %211 = vector.broadcast %15 : vector<1x128xf32> to vector<8x128xf32>
    %212 = arith.mulf %210, %211 : vector<8x128xf32>
    %213 = math.tanh %212 : vector<8x128xf32>
    %214 = vector.broadcast %15 : vector<1x128xf32> to vector<8x128xf32>
    %215 = arith.mulf %213, %214 : vector<8x128xf32>
    %216 = vector.broadcast %18 : vector<1x128xf32> to vector<8x128xf32>
    %217 = arith.addf %215, %216 : vector<8x128xf32>
    %218 = vector.extract_strided_slice %217 {offsets = [0, 0], sizes = [8, 32], strides = [1, 1]} : vector<8x128xf32> to vector<8x32xf32>
    %219 = vector.extract_strided_slice %217 {offsets = [0, 32], sizes = [8, 32], strides = [1, 1]} : vector<8x128xf32> to vector<8x32xf32>
    %220 = vector.extract_strided_slice %217 {offsets = [0, 64], sizes = [8, 32], strides = [1, 1]} : vector<8x128xf32> to vector<8x32xf32>
    %221 = vector.extract_strided_slice %217 {offsets = [0, 96], sizes = [8, 32], strides = [1, 1]} : vector<8x128xf32> to vector<8x32xf32>
    %222 = arith.mulf %219, %197 : vector<8x32xf32>
    %223 = arith.mulf %218, %220 : vector<8x32xf32>
    %224 = arith.addf %222, %223 : vector<8x32xf32>
    %225 = math.tanh %224 : vector<8x32xf32>
    %226 = arith.mulf %221, %225 : vector<8x32xf32>
    %cst_39 = arith.constant dense<0.000000e+00> : vector<8x128xf32>
    %227 = tpu.matmul %226, %5, %cst_39 {dimension_numbers = #tpu.dot_dimension_numbers<[1], [0], [0], [1], [0, 0, 1, 1], [], []>} : vector<8x32xf32>, vector<32x128xf32>, vector<8x128xf32> -> vector<8x128xf32>
    %228 = vector.broadcast %6 : vector<1x128xf32> to vector<8x128xf32>
    %229 = arith.addf %227, %228 : vector<8x128xf32>
    %230 = math.tanh %229 : vector<8x128xf32>
    %c1 = arith.constant 1 : index
    %c0_40 = arith.constant 0 : index
    %c0_41 = arith.constant 0 : index
    %231 = vector.load %arg10[%c1, %c0_40, %c0_41] : memref<8x8x128xf32, #tpu.memory_space<vmem>>, vector<1x8x128xf32>
    %232 = vector.shape_cast %231 : vector<1x8x128xf32> to vector<8x128xf32>
    %233 = vector.shape_cast %230 : vector<8x128xf32> to vector<1x8x128xf32>
    tpu.vector_store %arg10[%c1, %c0_40, %c0_41], %233 {strides = array<i32>} : memref<8x8x128xf32, #tpu.memory_space<vmem>>, vector<1x8x128xf32>,
    %234 = tpu.concatenate %230, %226 in 1 : vector<8x128xf32>, vector<8x32xf32> -> vector<8x160xf32>
    %cst_42 = arith.constant dense<0.000000e+00> : vector<8x128xf32>
    %235 = tpu.matmul %234, %3, %cst_42 {dimension_numbers = #tpu.dot_dimension_numbers<[1], [0], [0], [1], [0, 0, 1, 1], [], []>} : vector<8x160xf32>, vector<160x128xf32>, vector<8x128xf32> -> vector<8x128xf32>
    %236 = vector.broadcast %4 : vector<1x128xf32> to vector<8x128xf32>
    %237 = arith.addf %235, %236 : vector<8x128xf32>
    %238 = vector.broadcast %15 : vector<1x128xf32> to vector<8x128xf32>
    %239 = arith.mulf %237, %238 : vector<8x128xf32>
    %240 = math.tanh %239 : vector<8x128xf32>
    %241 = vector.broadcast %15 : vector<1x128xf32> to vector<8x128xf32>
    %242 = arith.mulf %240, %241 : vector<8x128xf32>
    %243 = vector.broadcast %18 : vector<1x128xf32> to vector<8x128xf32>
    %244 = arith.addf %242, %243 : vector<8x128xf32>
    %245 = vector.extract_strided_slice %244 {offsets = [0, 0], sizes = [8, 32], strides = [1, 1]} : vector<8x128xf32> to vector<8x32xf32>
    %246 = vector.extract_strided_slice %244 {offsets = [0, 32], sizes = [8, 32], strides = [1, 1]} : vector<8x128xf32> to vector<8x32xf32>
    %247 = vector.extract_strided_slice %244 {offsets = [0, 64], sizes = [8, 32], strides = [1, 1]} : vector<8x128xf32> to vector<8x32xf32>
    %248 = vector.extract_strided_slice %244 {offsets = [0, 96], sizes = [8, 32], strides = [1, 1]} : vector<8x128xf32> to vector<8x32xf32>
    %249 = arith.mulf %246, %224 : vector<8x32xf32>
    %250 = arith.mulf %245, %247 : vector<8x32xf32>
    %251 = arith.addf %249, %250 : vector<8x32xf32>
    %252 = math.tanh %251 : vector<8x32xf32>
    %253 = arith.mulf %248, %252 : vector<8x32xf32>
    %cst_43 = arith.constant dense<0.000000e+00> : vector<8x128xf32>
    %254 = tpu.matmul %253, %5, %cst_43 {dimension_numbers = #tpu.dot_dimension_numbers<[1], [0], [0], [1], [0, 0, 1, 1], [], []>} : vector<8x32xf32>, vector<32x128xf32>, vector<8x128xf32> -> vector<8x128xf32>
    %255 = vector.broadcast %6 : vector<1x128xf32> to vector<8x128xf32>
    %256 = arith.addf %254, %255 : vector<8x128xf32>
    %257 = math.tanh %256 : vector<8x128xf32>
    %c2 = arith.constant 2 : index
    %c0_44 = arith.constant 0 : index
    %c0_45 = arith.constant 0 : index
    %258 = vector.load %arg10[%c2, %c0_44, %c0_45] : memref<8x8x128xf32, #tpu.memory_space<vmem>>, vector<1x8x128xf32>
    %259 = vector.shape_cast %258 : vector<1x8x128xf32> to vector<8x128xf32>
    %260 = vector.shape_cast %257 : vector<8x128xf32> to vector<1x8x128xf32>
    tpu.vector_store %arg10[%c2, %c0_44, %c0_45], %260 {strides = array<i32>} : memref<8x8x128xf32, #tpu.memory_space<vmem>>, vector<1x8x128xf32>,
    %261 = tpu.concatenate %257, %253 in 1 : vector<8x128xf32>, vector<8x32xf32> -> vector<8x160xf32>
    %cst_46 = arith.constant dense<0.000000e+00> : vector<8x128xf32>
    %262 = tpu.matmul %261, %3, %cst_46 {dimension_numbers = #tpu.dot_dimension_numbers<[1], [0], [0], [1], [0, 0, 1, 1], [], []>} : vector<8x160xf32>, vector<160x128xf32>, vector<8x128xf32> -> vector<8x128xf32>
    %263 = vector.broadcast %4 : vector<1x128xf32> to vector<8x128xf32>
    %264 = arith.addf %262, %263 : vector<8x128xf32>
    %265 = vector.broadcast %15 : vector<1x128xf32> to vector<8x128xf32>
    %266 = arith.mulf %264, %265 : vector<8x128xf32>
    %267 = math.tanh %266 : vector<8x128xf32>
    %268 = vector.broadcast %15 : vector<1x128xf32> to vector<8x128xf32>
    %269 = arith.mulf %267, %268 : vector<8x128xf32>
    %270 = vector.broadcast %18 : vector<1x128xf32> to vector<8x128xf32>
    %271 = arith.addf %269, %270 : vector<8x128xf32>
    %272 = vector.extract_strided_slice %271 {offsets = [0, 0], sizes = [8, 32], strides = [1, 1]} : vector<8x128xf32> to vector<8x32xf32>
    %273 = vector.extract_strided_slice %271 {offsets = [0, 32], sizes = [8, 32], strides = [1, 1]} : vector<8x128xf32> to vector<8x32xf32>
    %274 = vector.extract_strided_slice %271 {offsets = [0, 64], sizes = [8, 32], strides = [1, 1]} : vector<8x128xf32> to vector<8x32xf32>
    %275 = vector.extract_strided_slice %271 {offsets = [0, 96], sizes = [8, 32], strides = [1, 1]} : vector<8x128xf32> to vector<8x32xf32>
    %276 = arith.mulf %273, %251 : vector<8x32xf32>
    %277 = arith.mulf %272, %274 : vector<8x32xf32>
    %278 = arith.addf %276, %277 : vector<8x32xf32>
    %279 = math.tanh %278 : vector<8x32xf32>
    %280 = arith.mulf %275, %279 : vector<8x32xf32>
    %cst_47 = arith.constant dense<0.000000e+00> : vector<8x128xf32>
    %281 = tpu.matmul %280, %5, %cst_47 {dimension_numbers = #tpu.dot_dimension_numbers<[1], [0], [0], [1], [0, 0, 1, 1], [], []>} : vector<8x32xf32>, vector<32x128xf32>, vector<8x128xf32> -> vector<8x128xf32>
    %282 = vector.broadcast %6 : vector<1x128xf32> to vector<8x128xf32>
    %283 = arith.addf %281, %282 : vector<8x128xf32>
    %284 = math.tanh %283 : vector<8x128xf32>
    %c3 = arith.constant 3 : index
    %c0_48 = arith.constant 0 : index
    %c0_49 = arith.constant 0 : index
    %285 = vector.load %arg10[%c3, %c0_48, %c0_49] : memref<8x8x128xf32, #tpu.memory_space<vmem>>, vector<1x8x128xf32>
    %286 = vector.shape_cast %285 : vector<1x8x128xf32> to vector<8x128xf32>
    %287 = vector.shape_cast %284 : vector<8x128xf32> to vector<1x8x128xf32>
    tpu.vector_store %arg10[%c3, %c0_48, %c0_49], %287 {strides = array<i32>} : memref<8x8x128xf32, #tpu.memory_space<vmem>>, vector<1x8x128xf32>,
    %288 = tpu.concatenate %284, %280 in 1 : vector<8x128xf32>, vector<8x32xf32> -> vector<8x160xf32>
    %cst_50 = arith.constant dense<0.000000e+00> : vector<8x128xf32>
    %289 = tpu.matmul %288, %3, %cst_50 {dimension_numbers = #tpu.dot_dimension_numbers<[1], [0], [0], [1], [0, 0, 1, 1], [], []>} : vector<8x160xf32>, vector<160x128xf32>, vector<8x128xf32> -> vector<8x128xf32>
    %290 = vector.broadcast %4 : vector<1x128xf32> to vector<8x128xf32>
    %291 = arith.addf %289, %290 : vector<8x128xf32>
    %292 = vector.broadcast %15 : vector<1x128xf32> to vector<8x128xf32>
    %293 = arith.mulf %291, %292 : vector<8x128xf32>
    %294 = math.tanh %293 : vector<8x128xf32>
    %295 = vector.broadcast %15 : vector<1x128xf32> to vector<8x128xf32>
    %296 = arith.mulf %294, %295 : vector<8x128xf32>
    %297 = vector.broadcast %18 : vector<1x128xf32> to vector<8x128xf32>
    %298 = arith.addf %296, %297 : vector<8x128xf32>
    %299 = vector.extract_strided_slice %298 {offsets = [0, 0], sizes = [8, 32], strides = [1, 1]} : vector<8x128xf32> to vector<8x32xf32>
    %300 = vector.extract_strided_slice %298 {offsets = [0, 32], sizes = [8, 32], strides = [1, 1]} : vector<8x128xf32> to vector<8x32xf32>
    %301 = vector.extract_strided_slice %298 {offsets = [0, 64], sizes = [8, 32], strides = [1, 1]} : vector<8x128xf32> to vector<8x32xf32>
    %302 = vector.extract_strided_slice %298 {offsets = [0, 96], sizes = [8, 32], strides = [1, 1]} : vector<8x128xf32> to vector<8x32xf32>
    %303 = arith.mulf %300, %278 : vector<8x32xf32>
    %304 = arith.mulf %299, %301 : vector<8x32xf32>
    %305 = arith.addf %303, %304 : vector<8x32xf32>
    %306 = math.tanh %305 : vector<8x32xf32>
    %307 = arith.mulf %302, %306 : vector<8x32xf32>
    %cst_51 = arith.constant dense<0.000000e+00> : vector<8x128xf32>
    %308 = tpu.matmul %307, %5, %cst_51 {dimension_numbers = #tpu.dot_dimension_numbers<[1], [0], [0], [1], [0, 0, 1, 1], [], []>} : vector<8x32xf32>, vector<32x128xf32>, vector<8x128xf32> -> vector<8x128xf32>
    %309 = vector.broadcast %6 : vector<1x128xf32> to vector<8x128xf32>
    %310 = arith.addf %308, %309 : vector<8x128xf32>
    %311 = math.tanh %310 : vector<8x128xf32>
    %c4 = arith.constant 4 : index
    %c0_52 = arith.constant 0 : index
    %c0_53 = arith.constant 0 : index
    %312 = vector.load %arg10[%c4, %c0_52, %c0_53] : memref<8x8x128xf32, #tpu.memory_space<vmem>>, vector<1x8x128xf32>
    %313 = vector.shape_cast %312 : vector<1x8x128xf32> to vector<8x128xf32>
    %314 = vector.shape_cast %311 : vector<8x128xf32> to vector<1x8x128xf32>
    tpu.vector_store %arg10[%c4, %c0_52, %c0_53], %314 {strides = array<i32>} : memref<8x8x128xf32, #tpu.memory_space<vmem>>, vector<1x8x128xf32>,
    %315 = tpu.concatenate %311, %307 in 1 : vector<8x128xf32>, vector<8x32xf32> -> vector<8x160xf32>
    %cst_54 = arith.constant dense<0.000000e+00> : vector<8x128xf32>
    %316 = tpu.matmul %315, %3, %cst_54 {dimension_numbers = #tpu.dot_dimension_numbers<[1], [0], [0], [1], [0, 0, 1, 1], [], []>} : vector<8x160xf32>, vector<160x128xf32>, vector<8x128xf32> -> vector<8x128xf32>
    %317 = vector.broadcast %4 : vector<1x128xf32> to vector<8x128xf32>
    %318 = arith.addf %316, %317 : vector<8x128xf32>
    %319 = vector.broadcast %15 : vector<1x128xf32> to vector<8x128xf32>
    %320 = arith.mulf %318, %319 : vector<8x128xf32>
    %321 = math.tanh %320 : vector<8x128xf32>
    %322 = vector.broadcast %15 : vector<1x128xf32> to vector<8x128xf32>
    %323 = arith.mulf %321, %322 : vector<8x128xf32>
    %324 = vector.broadcast %18 : vector<1x128xf32> to vector<8x128xf32>
    %325 = arith.addf %323, %324 : vector<8x128xf32>
    %326 = vector.extract_strided_slice %325 {offsets = [0, 0], sizes = [8, 32], strides = [1, 1]} : vector<8x128xf32> to vector<8x32xf32>
    %327 = vector.extract_strided_slice %325 {offsets = [0, 32], sizes = [8, 32], strides = [1, 1]} : vector<8x128xf32> to vector<8x32xf32>
    %328 = vector.extract_strided_slice %325 {offsets = [0, 64], sizes = [8, 32], strides = [1, 1]} : vector<8x128xf32> to vector<8x32xf32>
    %329 = vector.extract_strided_slice %325 {offsets = [0, 96], sizes = [8, 32], strides = [1, 1]} : vector<8x128xf32> to vector<8x32xf32>
    %330 = arith.mulf %327, %305 : vector<8x32xf32>
    %331 = arith.mulf %326, %328 : vector<8x32xf32>
    %332 = arith.addf %330, %331 : vector<8x32xf32>
    %333 = math.tanh %332 : vector<8x32xf32>
    %334 = arith.mulf %329, %333 : vector<8x32xf32>
    %cst_55 = arith.constant dense<0.000000e+00> : vector<8x128xf32>
    %335 = tpu.matmul %334, %5, %cst_55 {dimension_numbers = #tpu.dot_dimension_numbers<[1], [0], [0], [1], [0, 0, 1, 1], [], []>} : vector<8x32xf32>, vector<32x128xf32>, vector<8x128xf32> -> vector<8x128xf32>
    %336 = vector.broadcast %6 : vector<1x128xf32> to vector<8x128xf32>
    %337 = arith.addf %335, %336 : vector<8x128xf32>
    %338 = math.tanh %337 : vector<8x128xf32>
    %c5 = arith.constant 5 : index
    %c0_56 = arith.constant 0 : index
    %c0_57 = arith.constant 0 : index
    %339 = vector.load %arg10[%c5, %c0_56, %c0_57] : memref<8x8x128xf32, #tpu.memory_space<vmem>>, vector<1x8x128xf32>
    %340 = vector.shape_cast %339 : vector<1x8x128xf32> to vector<8x128xf32>
    %341 = vector.shape_cast %338 : vector<8x128xf32> to vector<1x8x128xf32>
    tpu.vector_store %arg10[%c5, %c0_56, %c0_57], %341 {strides = array<i32>} : memref<8x8x128xf32, #tpu.memory_space<vmem>>, vector<1x8x128xf32>,
    %342 = tpu.concatenate %338, %334 in 1 : vector<8x128xf32>, vector<8x32xf32> -> vector<8x160xf32>
    %cst_58 = arith.constant dense<0.000000e+00> : vector<8x128xf32>
    %343 = tpu.matmul %342, %3, %cst_58 {dimension_numbers = #tpu.dot_dimension_numbers<[1], [0], [0], [1], [0, 0, 1, 1], [], []>} : vector<8x160xf32>, vector<160x128xf32>, vector<8x128xf32> -> vector<8x128xf32>
    %344 = vector.broadcast %4 : vector<1x128xf32> to vector<8x128xf32>
    %345 = arith.addf %343, %344 : vector<8x128xf32>
    %346 = vector.broadcast %15 : vector<1x128xf32> to vector<8x128xf32>
    %347 = arith.mulf %345, %346 : vector<8x128xf32>
    %348 = math.tanh %347 : vector<8x128xf32>
    %349 = vector.broadcast %15 : vector<1x128xf32> to vector<8x128xf32>
    %350 = arith.mulf %348, %349 : vector<8x128xf32>
    %351 = vector.broadcast %18 : vector<1x128xf32> to vector<8x128xf32>
    %352 = arith.addf %350, %351 : vector<8x128xf32>
    %353 = vector.extract_strided_slice %352 {offsets = [0, 0], sizes = [8, 32], strides = [1, 1]} : vector<8x128xf32> to vector<8x32xf32>
    %354 = vector.extract_strided_slice %352 {offsets = [0, 32], sizes = [8, 32], strides = [1, 1]} : vector<8x128xf32> to vector<8x32xf32>
    %355 = vector.extract_strided_slice %352 {offsets = [0, 64], sizes = [8, 32], strides = [1, 1]} : vector<8x128xf32> to vector<8x32xf32>
    %356 = vector.extract_strided_slice %352 {offsets = [0, 96], sizes = [8, 32], strides = [1, 1]} : vector<8x128xf32> to vector<8x32xf32>
    %357 = arith.mulf %354, %332 : vector<8x32xf32>
    %358 = arith.mulf %353, %355 : vector<8x32xf32>
    %359 = arith.addf %357, %358 : vector<8x32xf32>
    %360 = math.tanh %359 : vector<8x32xf32>
    %361 = arith.mulf %356, %360 : vector<8x32xf32>
    %cst_59 = arith.constant dense<0.000000e+00> : vector<8x128xf32>
    %362 = tpu.matmul %361, %5, %cst_59 {dimension_numbers = #tpu.dot_dimension_numbers<[1], [0], [0], [1], [0, 0, 1, 1], [], []>} : vector<8x32xf32>, vector<32x128xf32>, vector<8x128xf32> -> vector<8x128xf32>
    %363 = vector.broadcast %6 : vector<1x128xf32> to vector<8x128xf32>
    %364 = arith.addf %362, %363 : vector<8x128xf32>
    %365 = math.tanh %364 : vector<8x128xf32>
    %c6 = arith.constant 6 : index
    %c0_60 = arith.constant 0 : index
    %c0_61 = arith.constant 0 : index
    %366 = vector.load %arg10[%c6, %c0_60, %c0_61] : memref<8x8x128xf32, #tpu.memory_space<vmem>>, vector<1x8x128xf32>
    %367 = vector.shape_cast %366 : vector<1x8x128xf32> to vector<8x128xf32>
    %368 = vector.shape_cast %365 : vector<8x128xf32> to vector<1x8x128xf32>
    tpu.vector_store %arg10[%c6, %c0_60, %c0_61], %368 {strides = array<i32>} : memref<8x8x128xf32, #tpu.memory_space<vmem>>, vector<1x8x128xf32>,
    %369 = tpu.concatenate %365, %361 in 1 : vector<8x128xf32>, vector<8x32xf32> -> vector<8x160xf32>
    %cst_62 = arith.constant dense<0.000000e+00> : vector<8x128xf32>
    %370 = tpu.matmul %369, %3, %cst_62 {dimension_numbers = #tpu.dot_dimension_numbers<[1], [0], [0], [1], [0, 0, 1, 1], [], []>} : vector<8x160xf32>, vector<160x128xf32>, vector<8x128xf32> -> vector<8x128xf32>
    %371 = vector.broadcast %4 : vector<1x128xf32> to vector<8x128xf32>
    %372 = arith.addf %370, %371 : vector<8x128xf32>
    %373 = vector.broadcast %15 : vector<1x128xf32> to vector<8x128xf32>
    %374 = arith.mulf %372, %373 : vector<8x128xf32>
    %375 = math.tanh %374 : vector<8x128xf32>
    %376 = vector.broadcast %15 : vector<1x128xf32> to vector<8x128xf32>
    %377 = arith.mulf %375, %376 : vector<8x128xf32>
    %378 = vector.broadcast %18 : vector<1x128xf32> to vector<8x128xf32>
    %379 = arith.addf %377, %378 : vector<8x128xf32>
    %380 = vector.extract_strided_slice %379 {offsets = [0, 0], sizes = [8, 32], strides = [1, 1]} : vector<8x128xf32> to vector<8x32xf32>
    %381 = vector.extract_strided_slice %379 {offsets = [0, 32], sizes = [8, 32], strides = [1, 1]} : vector<8x128xf32> to vector<8x32xf32>
    %382 = vector.extract_strided_slice %379 {offsets = [0, 64], sizes = [8, 32], strides = [1, 1]} : vector<8x128xf32> to vector<8x32xf32>
    %383 = vector.extract_strided_slice %379 {offsets = [0, 96], sizes = [8, 32], strides = [1, 1]} : vector<8x128xf32> to vector<8x32xf32>
    %384 = arith.mulf %381, %359 : vector<8x32xf32>
    %385 = arith.mulf %380, %382 : vector<8x32xf32>
    %386 = arith.addf %384, %385 : vector<8x32xf32>
    %387 = math.tanh %386 : vector<8x32xf32>
    %388 = arith.mulf %383, %387 : vector<8x32xf32>
    %cst_63 = arith.constant dense<0.000000e+00> : vector<8x128xf32>
    %389 = tpu.matmul %388, %5, %cst_63 {dimension_numbers = #tpu.dot_dimension_numbers<[1], [0], [0], [1], [0, 0, 1, 1], [], []>} : vector<8x32xf32>, vector<32x128xf32>, vector<8x128xf32> -> vector<8x128xf32>
    %390 = vector.broadcast %6 : vector<1x128xf32> to vector<8x128xf32>
    %391 = arith.addf %389, %390 : vector<8x128xf32>
    %392 = math.tanh %391 : vector<8x128xf32>
    %c7 = arith.constant 7 : index
    %c0_64 = arith.constant 0 : index
    %c0_65 = arith.constant 0 : index
    %393 = vector.load %arg10[%c7, %c0_64, %c0_65] : memref<8x8x128xf32, #tpu.memory_space<vmem>>, vector<1x8x128xf32>
    %394 = vector.shape_cast %393 : vector<1x8x128xf32> to vector<8x128xf32>
    %395 = vector.shape_cast %392 : vector<8x128xf32> to vector<1x8x128xf32>
    tpu.vector_store %arg10[%c7, %c0_64, %c0_65], %395 {strides = array<i32>} : memref<8x8x128xf32, #tpu.memory_space<vmem>>, vector<1x8x128xf32>,
    return
  }
  func.func @transform_0(%arg0: i32) -> (i32, i32, i32) {
    %c0_i32 = arith.constant 0 : i32
    %c0_i32_0 = arith.constant 0 : i32
    %c0_i32_1 = arith.constant 0 : i32
    return %c0_i32, %arg0, %c0_i32_0 : i32, i32, i32
  }
  func.func @transform_1(%arg0: i32) -> (i32, i32) {
    %c0_i32 = arith.constant 0 : i32
    %c0_i32_0 = arith.constant 0 : i32
    return %arg0, %c0_i32 : i32, i32
  }
  func.func @transform_2(%arg0: i32) -> (i32, i32) {
    %c0_i32 = arith.constant 0 : i32
    %c0_i32_0 = arith.constant 0 : i32
    %c0_i32_1 = arith.constant 0 : i32
    return %c0_i32, %c0_i32_0 : i32, i32
  }
  func.func @transform_3(%arg0: i32) -> (i32, i32) {
    %c0_i32 = arith.constant 0 : i32
    %c0_i32_0 = arith.constant 0 : i32
    %c0_i32_1 = arith.constant 0 : i32
    return %c0_i32, %c0_i32_0 : i32, i32
  }
  func.func @transform_4(%arg0: i32) -> (i32, i32) {
    %c0_i32 = arith.constant 0 : i32
    %c0_i32_0 = arith.constant 0 : i32
    %c0_i32_1 = arith.constant 0 : i32
    return %c0_i32, %c0_i32_0 : i32, i32
  }
  func.func @transform_5(%arg0: i32) -> (i32, i32) {
    %c0_i32 = arith.constant 0 : i32
    %c0_i32_0 = arith.constant 0 : i32
    %c0_i32_1 = arith.constant 0 : i32
    return %c0_i32, %c0_i32_0 : i32, i32
  }
  func.func @transform_6(%arg0: i32) -> (i32, i32) {
    %c0_i32 = arith.constant 0 : i32
    %c0_i32_0 = arith.constant 0 : i32
    %c0_i32_1 = arith.constant 0 : i32
    return %c0_i32, %c0_i32_0 : i32, i32
  }
  func.func @transform_7(%arg0: i32) -> (i32, i32) {
    %c0_i32 = arith.constant 0 : i32
    %c0_i32_0 = arith.constant 0 : i32
    %c0_i32_1 = arith.constant 0 : i32
    return %c0_i32, %c0_i32_0 : i32, i32
  }
  func.func @transform_8(%arg0: i32) -> (i32, i32) {
    %c0_i32 = arith.constant 0 : i32
    %c0_i32_0 = arith.constant 0 : i32
    %c0_i32_1 = arith.constant 0 : i32
    return %c0_i32, %c0_i32_0 : i32, i32
  }
  func.func @transform_9(%arg0: i32) -> (i32, i32, i32) {
    %c0_i32 = arith.constant 0 : i32
    %c0_i32_0 = arith.constant 0 : i32
    %c0_i32_1 = arith.constant 0 : i32
    return %c0_i32, %arg0, %c0_i32_0 : i32, i32, i32
  }
}

</mosaic_0001>

<bundles_post_ra>
// kernel: tpu_custom_call.1
= control target key start
LH: loop header
LB: loop body
LE: loop exit
PB: predicated region body
PF: predicated region fallthrough
CT: control target
= control target key end

     0   :  { %14 = vsyncpa [#allocation3], 0  ;;  %s2065_s0 = inlined_call_operand.vmem [shape: f32[8,8,2], index: 0, kind: input, shape index: {}]   ;;  %s2066_s1 = inlined_call_operand.vmem [shape: f32[8,128], index: 1, kind: input, shape index: {}]   ;;  %s2067_s2 = inlined_call_operand.vmem [shape: f32[2,128], index: 2, kind: input, shape index: {}]   ;;  %s2068_s3 = inlined_call_operand.vmem [shape: f32[32,128], index: 3, kind: input, shape index: {}]   ;;  %s2069_s4 = inlined_call_operand.vmem [shape: f32[1,128], index: 4, kind: input, shape index: {}]   ;;  %s2070_s5 = inlined_call_operand.hbm [shape: f32[160,128], index: 5, kind: input, shape index: {}]   ;;  %s2071_s6 = inlined_call_operand.vmem [shape: f32[1,128], index: 6, kind: input, shape index: {}]   ;;  %s2072_s7 = inlined_call_operand.vmem [shape: f32[32,128], index: 7, kind: input, shape index: {}]   ;;  %s2073_s8 = inlined_call_operand.vmem [shape: f32[1,128], index: 8, kind: input, shape index: {}]   ;;  %s2074_s9 = inlined_call_operand.hbm [shape: f32[8,8,128], index: 9, kind: output, shape index: {}]  }
   0x1   :  { %15 = vsyncpa [#allocation4], 0  ;;  %s30_s11 = sshll.u32 %s2070_s5, 4  ;;  %s1461_s12 = smov [#allocation2]   ;;  %s31_s11 = int_to_ptr.hbm [resolvable:$true] %s30_s11 }
   0x2   :  { %s32_s13 = sshll.u32 %s1461_s12, 4  ;;  %s1462_s14 = smov 128   ;;  %s33_s13 = int_to_ptr.vmem [resolvable:$true] %s32_s13 }
   0x3   :  { %s1463_s15 = smov 8  }
   0x4   :  { %38 = dma.hbm_to_vmem [thread:$0]  %s31_s11, 2560, %s33_s13, [#allocation3], %s1462_s14, %s1462_s14, %s1463_s15  }
   0x5   :  { %1457 = dma.done.wait [#allocation3], 2560  }
   0x6   :  { %1458 = vsyncadd [#allocation3], 4294964736  ;;  %vm124_vm0 = vcmask 1041408   ;;  %v1528_v0 = vld [vmem:[%s2068_s3 + $0x18] sm:$0xff]  ;;  %v1533_v1 = vld [vmem:[%s2068_s3 + $0x10] sm:$0xff]  ;;  %vm99_vm1 = vcmask 15360   ;;  %v81_v7 = vlaneseq }
   0x7   :  { %185 = vmatpush.msra.mxu3 %v1528_v0  ;;  %v49_v2 = vld [vmem:[%s2067_s2] sm:$0x3]  ;;  %232 = vmatpush.msra.mxu2 %v1528_v0  ;;  %v1546_v4 = vld [vmem:[%s2068_s3 + $0x8] sm:$0xff]  ;;  %v1464_v6 = vmov 0.0   ;;  %v1465_v12 = vmov 0.5   ;;  %s1467_s27 = smov 32  }
   0x8   :  { %v88_v3 = vld [vmem:[%s2065_s0] sm:$0xff]  ;;  %1286 = vmatpush.msk.msra.mxu0 %vm124_vm0, %v49_v2  ;;  %326 = vmatpush.msra.mxu1 %v1528_v0  ;;  %v82_v8 = vand.u32 127, %v81_v7  ;;  %v89_v29 = vld [vmem:[%s2065_s0 + $0x8] sm:$0xff]  ;;  %vm169_vm5 = vcmask 261120   ;;  %v90_v47 = vld [vmem:[%s2065_s0 + $0x10] sm:$0xff]  ;;  %s1273_s13 = sshll.u32 %s2074_s9, 4  ;;  %s1274_s13 = int_to_ptr.hbm [resolvable:$true] %s1273_s13 }
   0x9   :  { %186 = vmatpush.msra.mxu3 %v1533_v1  ;;  %1287 = vmatmul.msk.f32.vlgmr.msra.gmra.mxu0 %vm99_vm1, %v88_v3  ;;  %v1554_v5 = vld [vmem:[%s2068_s3] sm:$0xff]  ;;  %v91_v63 = vld [vmem:[%s2065_s0 + $0x18] sm:$0xff] }
   0xa   :  { %233 = vmatpush.msra.mxu2 %v1533_v1  ;;  %327 = vmatpush.msra.mxu1 %v1533_v1  ;;  %v1583_v9 = vld [vmem:[%s2069_s4] ss:$0 sm:$0xff]  ;;  %vm83_vm2 = vcmp.ge.s32.totalorder %v82_v8, 64  ;;  %vm84_vm3 = vcmp.lt.s32.totalorder %v82_v8, 96  ;;  %s1466_s4 = smov 64  }
   0xb   :  { %187 = vmatpush.msra.mxu3 %v1546_v4  ;;  %vm85_vm4 = vmand %vm83_vm2, %vm84_vm3 }
   0xc   :  { %234 = vmatpush.msra.mxu2 %v1546_v4  ;;  %328 = vmatpush.msra.mxu1 %v1546_v4  ;;  %v1586_v13 = vsel %vm85_vm4, 1.0, %v1465_v12  ;;  %v1589_v18 = vsel %vm85_vm4, 0.0, %v1465_v12 }
   0xd   :  { %188 = vmatpush.msra.mxu3 %v1554_v5 }
   0xe   :  { %189 = vmatmul.f32.vlgmr.msra.gmra.mxu3 %v1464_v6  ;;  %235 = vmatpush.msra.mxu2 %v1554_v5 }
   0xf   :  { %279 = vmatpush.msrb.mxu3 %v1528_v0  ;;  %329 = vmatpush.msra.mxu1 %v1554_v5 }
  0x10   :  { %373 = vmatpush.msrb.mxu2 %v1528_v0 }
  0x11   :  { %467 = vmatpush.msrb.mxu1 %v1528_v0  ;;  %280 = vmatpush.msrb.mxu3 %v1533_v1 }
  0x12   :  { %374 = vmatpush.msrb.mxu2 %v1533_v1  ;;  %1288 = vmatmul.msk.f32.gmra.mxu0 %vm99_vm1, %v89_v29 }
  0x13   :  { %468 = vmatpush.msrb.mxu1 %v1533_v1  ;;  %281 = vmatpush.msrb.mxu3 %v1546_v4 }
  0x14   :  { %375 = vmatpush.msrb.mxu2 %v1546_v4 }
  0x15   :  { %469 = vmatpush.msrb.mxu1 %v1546_v4  ;;  %282 = vmatpush.msrb.mxu3 %v1554_v5 }
  0x16   :  { %376 = vmatpush.msrb.mxu2 %v1554_v5 }
  0x17   :  { %420 = vmatpush.msra.mxu3 %v1528_v0  ;;  %470 = vmatpush.msrb.mxu1 %v1554_v5 }
  0x19   :  { %421 = vmatpush.msra.mxu3 %v1533_v1 }
  0x1a   :  { %1289 = vmatmul.msk.f32.gmra.mxu0 %vm99_vm1, %v90_v47 }
  0x1b   :  { %422 = vmatpush.msra.mxu3 %v1546_v4 }
  0x1d   :  { %423 = vmatpush.msra.mxu3 %v1554_v5 }
  0x22   :  { %1290 = vmatmul.msk.f32.gmra.mxu0 %vm99_vm1, %v91_v63 }
  0x86   :  { %v145_v10 = vpop.f32.mrf.mxu0 }
  0x87   :  { %v146_v11 = vadd.f32 %v1583_v9, %v145_v10 }
  0x8f   :  { %v148_v31 = vpop.f32.mrf.mxu0 }
  0x90   :  { %v149_v32 = vadd.f32 %v1583_v9, %v148_v31 }
  0x91   :  { %v190_v14 = vpop.f32.mrf.mxu3 }
  0x92   :  { %v193_v15 = vadd.f32 %v190_v14, %v146_v11 }
  0x94   :  { %v194_v16 = vmul.f32 %v193_v15, %v1586_v13 }
  0x96   :  { %1329 = vtanh.f32 %v194_v16 }
  0x97   :  { %v151_v49 = vpop.f32.mrf.mxu0 }
  0x98   :  { %v152_v50 = vadd.f32 %v1583_v9, %v151_v49 }
  0x9c   :  { %v1330_v17 = vpop.eup %1329 }
  0x9d   :  { %v196_v19 = vmul.f32 %v1330_v17, %v1586_v13 }
  0x9f   :  { %v197_v20 = vadd.f32 %v196_v19, %v1589_v18  ;;  %v154_v3 = vpop.f32.mrf.mxu0 }
  0xa1   :  { %200 = vrot.lane.b32.xlu0 %v197_v20, %s1466_s4  ;;  %v198_v23 = vmul.f32 0.0, %v197_v20 }
 0x113   :  { %v201_v21 = vpop.permute.xlu0 %200 }
 0x114   :  { %v203_v22 = vmul.f32 %v201_v21, %v197_v20 }
 0x116   :  { %205 = vrot.lane.b32.xlu0 %v203_v22, %s1467_s27  ;;  %v92_v22 = vld [vmem:[%s2065_s0 + $0x20] sm:$0xff] }
 0x117   :  { %1291 = vmatmul.msk.f32.gmra.mxu0 %vm99_vm1, %v92_v22 }
 0x188   :  { %v206_v24 = vpop.permute.xlu0 %205 }
 0x189   :  { %v208_v25 = vadd.f32 %v206_v24, %v198_v23 }
 0x18b   :  { %1331 = vtanh.f32 %v208_v25 }
 0x191   :  { %v1332_v26 = vpop.eup %1331 }
 0x192   :  { %211 = vrot.lane.b32.xlu1 %v1332_v26, %s1466_s4 }
 0x194   :  { %v157_v24 = vpop.f32.mrf.mxu0 }
 0x204   :  { %v212_v27 = vpop.permute.xlu1 %211 }
 0x205   :  { %v214_v28 = vmul.f32 %v212_v27, %v197_v20 }
 0x207   :  { %216 = vrot.lane.b32.xlu1 %v214_v28, %s1467_s27 }
 0x279   :  { %v217_v30 = vpop.permute.xlu1 %216 }
 0x27a   :  { %1295 = vmatmul.msk.f32.vlgmr.msra.gmra.mxu2 %vm169_vm5, %v217_v30 }
 0x27b   :  { %514 = vmatpush.msra.mxu2 %v1528_v0 }
 0x27d   :  { %515 = vmatpush.msra.mxu2 %v1533_v1 }
 0x27f   :  { %516 = vmatpush.msra.mxu2 %v1546_v4  ;;  %v155_v4 = vadd.f32 %v1583_v9, %v154_v3 }
 0x281   :  { %517 = vmatpush.msra.mxu2 %v1554_v5 }
 0x2fd   :  { %v237_v33 = vpop.f32.mrf.mxu2 }
 0x2fe   :  { %v240_v34 = vadd.f32 %v237_v33, %v149_v32 }
 0x300   :  { %v241_v35 = vmul.f32 %v240_v34, %v1586_v13 }
 0x302   :  { %1333 = vtanh.f32 %v241_v35 }
 0x308   :  { %v1334_v36 = vpop.eup %1333 }
 0x309   :  { %v243_v37 = vmul.f32 %v1334_v36, %v1586_v13 }
 0x30b   :  { %v244_v38 = vadd.f32 %v243_v37, %v1589_v18 }
 0x30d   :  { %247 = vrot.lane.b32.xlu2 %v244_v38, %s1466_s4  ;;  %v245_v41 = vmul.f32 %v244_v38, %v208_v25  ;;  %v158_v25 = vadd.f32 %v1583_v9, %v157_v24 }
 0x367   :  { %v248_v39 = vpop.permute.xlu2 %247 }
 0x368   :  { %v250_v40 = vmul.f32 %v248_v39, %v244_v38 }
 0x36a   :  { %252 = vrot.lane.b32.xlu2 %v250_v40, %s1467_s27  ;;  %v93_v40 = vld [vmem:[%s2065_s0 + $0x28] sm:$0xff] }
 0x36b   :  { %1292 = vmatmul.msk.f32.gmra.mxu0 %vm99_vm1, %v93_v40  ;;  %v1728_v40 = vld [vmem:[#allocation2 + $0x48] sm:$0xff] }
 0x3c4   :  { %v253_v42 = vpop.permute.xlu2 %252 }
 0x3c5   :  { %v255_v43 = vadd.f32 %v253_v42, %v245_v41 }
 0x3c7   :  { %1335 = vtanh.f32 %v255_v43 }
 0x3cd   :  { %v1336_v44 = vpop.eup %1335 }
 0x3ce   :  { %258 = vrot.lane.b32.xlu0 %v1336_v44, %s1466_s4 }
 0x3e8   :  { %v160_v42 = vpop.f32.mrf.mxu0 }
 0x440   :  { %v259_v45 = vpop.permute.xlu0 %258 }
 0x441   :  { %v261_v46 = vmul.f32 %v259_v45, %v244_v38 }
 0x443   :  { %263 = vrot.lane.b32.xlu1 %v261_v46, %s1467_s27 }
 0x4b5   :  { %v264_v48 = vpop.permute.xlu1 %263 }
 0x4b6   :  { %1296 = vmatmul.msk.f32.vlgmr.msrb.gmra.mxu3 %vm169_vm5, %v264_v48 }
 0x539   :  { %v284_v51 = vpop.f32.mrf.mxu3 }
 0x53a   :  { %v287_v52 = vadd.f32 %v284_v51, %v152_v50 }
 0x53c   :  { %v288_v53 = vmul.f32 %v287_v52, %v1586_v13 }
 0x53e   :  { %1337 = vtanh.f32 %v288_v53 }
 0x544   :  { %v1338_v54 = vpop.eup %1337 }
 0x545   :  { %v290_v55 = vmul.f32 %v1338_v54, %v1586_v13 }
 0x547   :  { %v291_v56 = vadd.f32 %v290_v55, %v1589_v18 }
 0x549   :  { %294 = vrot.lane.b32.xlu2 %v291_v56, %s1466_s4  ;;  %v292_v59 = vmul.f32 %v291_v56, %v255_v43  ;;  %v161_v43 = vadd.f32 %v1583_v9, %v160_v42  ;;  %v1738_v42 = vld [vmem:[#allocation2 + $0x38] sm:$0xff] }
 0x5a3   :  { %v295_v57 = vpop.permute.xlu2 %294 }
 0x5a4   :  { %v297_v58 = vmul.f32 %v295_v57, %v291_v56 }
 0x5a6   :  { %299 = vrot.lane.b32.xlu0 %v297_v58, %s1467_s27 }
 0x618   :  { %v300_v60 = vpop.permute.xlu0 %299 }
 0x619   :  { %v302_v61 = vadd.f32 %v300_v60, %v292_v59 }
 0x61b   :  { %1339 = vtanh.f32 %v302_v61 }
 0x621   :  { %v1340_v62 = vpop.eup %1339 }
 0x622   :  { %305 = vrot.lane.b32.xlu1 %v1340_v62, %s1466_s4 }
 0x694   :  { %v306_v0 = vpop.permute.xlu1 %305 }
 0x695   :  { %v308_v1 = vmul.f32 %v306_v0, %v291_v56  ;;  %v94_v56 = vld [vmem:[%s2065_s0 + $0x30] sm:$0xff] }
 0x696   :  { %1293 = vmatmul.msk.f32.gmra.mxu0 %vm99_vm1, %v94_v56 }
 0x697   :  { %310 = vrot.lane.b32.xlu2 %v308_v1, %s1467_s27 }
 0x6f1   :  { %v311_v2 = vpop.permute.xlu2 %310 }
 0x6f2   :  { %1297 = vmatmul.msk.f32.vlgmr.msra.gmra.mxu1 %vm169_vm5, %v311_v2 }
 0x713   :  { %v163_v60 = vpop.f32.mrf.mxu0 }
 0x76f   :  { %v331_v5 = vpop.f32.mrf.mxu1 }
 0x770   :  { %v334_v6 = vadd.f32 %v331_v5, %v155_v4 }
 0x772   :  { %v335_v7 = vmul.f32 %v334_v6, %v1586_v13 }
 0x774   :  { %1341 = vtanh.f32 %v335_v7 }
 0x77a   :  { %v1342_v8 = vpop.eup %1341 }
 0x77b   :  { %v337_v10 = vmul.f32 %v1342_v8, %v1586_v13 }
 0x77d   :  { %v338_v11 = vadd.f32 %v337_v10, %v1589_v18 }
 0x77f   :  { %341 = vrot.lane.b32.xlu0 %v338_v11, %s1466_s4  ;;  %v339_v15 = vmul.f32 %v338_v11, %v302_v61  ;;  %v164_v61 = vadd.f32 %v1583_v9, %v163_v60 }
 0x7f1   :  { %v342_v12 = vpop.permute.xlu0 %341 }
 0x7f2   :  { %v344_v14 = vmul.f32 %v342_v12, %v338_v11 }
 0x7f4   :  { %346 = vrot.lane.b32.xlu1 %v344_v14, %s1467_s27  ;;  %v95_v14 = vld [vmem:[%s2065_s0 + $0x38] sm:$0xff] }
 0x7f5   :  { %1294 = vmatmul.msk.f32.gmra.mxu0 %vm99_vm1, %v95_v14  ;;  %v1867_v14 = vld [vmem:[%s2073_s8] ss:$0 sm:$0xff]  ;;  %s1468_s8 = smov [#allocation5]  }
 0x7f6   :  { %s1271_s10 = sshll.u32 %s1468_s8, 4  ;;  %s1272_s10 = int_to_ptr.vmem [resolvable:$true] %s1271_s10 }
 0x866   :  { %v347_v16 = vpop.permute.xlu1 %346 }
 0x867   :  { %v349_v17 = vadd.f32 %v347_v16, %v339_v15 }
 0x869   :  { %1343 = vtanh.f32 %v349_v17 }
 0x86f   :  { %v1344_v19 = vpop.eup %1343 }
 0x870   :  { %352 = vrot.lane.b32.xlu2 %v1344_v19, %s1466_s4 }
 0x872   :  { %v166_v16 = vpop.f32.mrf.mxu0 }
 0x8ca   :  { %v353_v20 = vpop.permute.xlu2 %352 }
 0x8cb   :  { %v355_v21 = vmul.f32 %v353_v20, %v338_v11 }
 0x8cd   :  { %357 = vrot.lane.b32.xlu0 %v355_v21, %s1467_s27 }
 0x93f   :  { %v358_v23 = vpop.permute.xlu0 %357 }
 0x940   :  { %1298 = vmatmul.msk.f32.vlgmr.msrb.gmra.mxu2 %vm169_vm5, %v358_v23 }
 0x9c3   :  { %v378_v26 = vpop.f32.mrf.mxu2 }
 0x9c4   :  { %v381_v27 = vadd.f32 %v378_v26, %v158_v25 }
 0x9c6   :  { %v382_v28 = vmul.f32 %v381_v27, %v1586_v13 }
 0x9c8   :  { %1345 = vtanh.f32 %v382_v28 }
 0x9ce   :  { %v1346_v29 = vpop.eup %1345 }
 0x9cf   :  { %v384_v30 = vmul.f32 %v1346_v29, %v1586_v13 }
 0x9d1   :  { %v385_v31 = vadd.f32 %v384_v30, %v1589_v18  ;;  %v1696_v30 = vld [vmem:[#allocation2 + $0x78] sm:$0xff] }
 0x9d2   :  { %553 = vmatpush.msrb.mxu3 %v1696_v30  ;;  %733 = vmatpush.msrb.mxu0 %v1696_v30 }
 0x9d3   :  { %388 = vrot.lane.b32.xlu1 %v385_v31, %s1466_s4  ;;  %v386_v34 = vmul.f32 %v385_v31, %v349_v17  ;;  %v167_v17 = vadd.f32 %v1583_v9, %v166_v16 }
 0xa45   :  { %v389_v32 = vpop.permute.xlu1 %388 }
 0xa46   :  { %v391_v33 = vmul.f32 %v389_v32, %v385_v31  ;;  %v1702_v32 = vld [vmem:[#allocation2 + $0x68] sm:$0xff] }
 0xa48   :  { %393 = vrot.lane.b32.xlu2 %v391_v33, %s1467_s27  ;;  %v1706_v33 = vld [vmem:[#allocation2 + $0x60] sm:$0xff] }
 0xaa2   :  { %v394_v35 = vpop.permute.xlu2 %393 }
 0xaa3   :  { %v396_v36 = vadd.f32 %v394_v35, %v386_v34  ;;  %v1709_v34 = vld [vmem:[#allocation2 + $0x98] sm:$0xff] }
 0xaa4   :  { %v1712_v35 = vld [vmem:[#allocation2 + $0x58] sm:$0xff]  ;;  %585 = vmatpush.msra.mxu1 %v1709_v34 }
 0xaa5   :  { %1347 = vtanh.f32 %v396_v36 }
 0xaab   :  { %v1348_v37 = vpop.eup %1347 }
 0xaac   :  { %399 = vrot.lane.b32.xlu0 %v1348_v37, %s1466_s4  ;;  %v1718_v37 = vld [vmem:[#allocation2 + $0x88] sm:$0xff] }
 0xb1e   :  { %v400_v38 = vpop.permute.xlu0 %399 }
 0xb1f   :  { %v402_v39 = vmul.f32 %v400_v38, %v385_v31  ;;  %v1698_v31 = vld [vmem:[#allocation2 + $0x70] sm:$0xff] }
 0xb20   :  { %554 = vmatpush.msrb.mxu3 %v1698_v31  ;;  %734 = vmatpush.msrb.mxu0 %v1698_v31  ;;  %v1721_v38 = vld [vmem:[#allocation2 + $0x50] sm:$0xff] }
 0xb21   :  { %404 = vrot.lane.b32.xlu1 %v402_v39, %s1467_s27  ;;  %v1725_v39 = vld [vmem:[#allocation2 + $0x80] sm:$0xff] }
 0xb22   :  { %555 = vmatpush.msrb.mxu3 %v1702_v32  ;;  %735 = vmatpush.msrb.mxu0 %v1702_v32 }
 0xb24   :  { %556 = vmatpush.msrb.mxu3 %v1706_v33  ;;  %736 = vmatpush.msrb.mxu0 %v1706_v33 }
 0xb26   :  { %557 = vmatpush.msrb.mxu3 %v1712_v35  ;;  %737 = vmatpush.msrb.mxu0 %v1712_v35 }
 0xb28   :  { %558 = vmatpush.msrb.mxu3 %v1721_v38  ;;  %738 = vmatpush.msrb.mxu0 %v1721_v38 }
 0xb2a   :  { %559 = vmatpush.msrb.mxu3 %v1728_v40  ;;  %739 = vmatpush.msrb.mxu0 %v1728_v40 }
 0xb93   :  { %v405_v41 = vpop.permute.xlu1 %404 }
 0xb94   :  { %1299 = vmatmul.msk.f32.vlgmr.msra.gmra.mxu3 %vm169_vm5, %v405_v41  ;;  %v1733_v41 = vld [vmem:[#allocation2 + $0x40] sm:$0xff] }
 0xb95   :  { %560 = vmatpush.msrb.mxu3 %v1733_v41  ;;  %740 = vmatpush.msrb.mxu0 %v1733_v41 }
 0xb97   :  { %561 = vmatpush.msrb.mxu3 %v1738_v42  ;;  %741 = vmatpush.msrb.mxu0 %v1738_v42 }
 0xc17   :  { %v425_v44 = vpop.f32.mrf.mxu3 }
 0xc18   :  { %v428_v45 = vadd.f32 %v425_v44, %v161_v43  ;;  %v1743_v43 = vld [vmem:[#allocation2 + $0x30] sm:$0xff]  ;;  %v1748_v44 = vld [vmem:[#allocation2 + $0x28] sm:$0xff] }
 0xc19   :  { %562 = vmatpush.msrb.mxu3 %v1743_v43  ;;  %742 = vmatpush.msrb.mxu0 %v1743_v43 }
 0xc1a   :  { %v429_v46 = vmul.f32 %v428_v45, %v1586_v13  ;;  %v1753_v45 = vld [vmem:[#allocation2 + $0x20] sm:$0xff] }
 0xc1b   :  { %563 = vmatpush.msrb.mxu3 %v1748_v44  ;;  %743 = vmatpush.msrb.mxu0 %v1748_v44 }
 0xc1c   :  { %1349 = vtanh.f32 %v429_v46  ;;  %v1758_v46 = vld [vmem:[#allocation2 + $0x18] sm:$0xff] }
 0xc1d   :  { %564 = vmatpush.msrb.mxu3 %v1753_v45  ;;  %744 = vmatpush.msrb.mxu0 %v1753_v45 }
 0xc1f   :  { %565 = vmatpush.msrb.mxu3 %v1758_v46  ;;  %745 = vmatpush.msrb.mxu0 %v1758_v46 }
 0xc22   :  { %v1350_v47 = vpop.eup %1349 }
 0xc23   :  { %v431_v48 = vmul.f32 %v1350_v47, %v1586_v13  ;;  %v1763_v47 = vld [vmem:[#allocation2 + $0x10] sm:$0xff] }
 0xc24   :  { %566 = vmatpush.msrb.mxu3 %v1763_v47  ;;  %746 = vmatpush.msrb.mxu0 %v1763_v47 }
 0xc25   :  { %v432_v49 = vadd.f32 %v431_v48, %v1589_v18  ;;  %v1768_v48 = vld [vmem:[#allocation2 + $0x8] sm:$0xff] }
 0xc26   :  { %567 = vmatpush.msrb.mxu3 %v1768_v48  ;;  %747 = vmatpush.msrb.mxu0 %v1768_v48 }
 0xc27   :  { %435 = vrot.lane.b32.xlu2 %v432_v49, %s1466_s4  ;;  %v433_v52 = vmul.f32 %v432_v49, %v396_v36  ;;  %v1715_v36 = vld [vmem:[#allocation2 + $0x90] sm:$0xff] }
 0xc28   :  { %586 = vmatpush.msra.mxu1 %v1715_v36 }
 0xc2a   :  { %587 = vmatpush.msra.mxu1 %v1718_v37 }
 0xc2c   :  { %588 = vmatpush.msra.mxu1 %v1725_v39 }
 0xc81   :  { %v436_v50 = vpop.permute.xlu2 %435 }
 0xc82   :  { %v438_v51 = vmul.f32 %v436_v50, %v432_v49 }
 0xc84   :  { %440 = vrot.lane.b32.xlu0 %v438_v51, %s1467_s27  ;;  %v544_v51 = vld [vmem:[%s2066_s1] sm:$0xff] }
 0xcf6   :  { %v441_v53 = vpop.permute.xlu0 %440 }
 0xcf7   :  { %v443_v54 = vadd.f32 %v441_v53, %v433_v52 }
 0xcf9   :  { %1351 = vtanh.f32 %v443_v54 }
 0xcff   :  { %v1352_v55 = vpop.eup %1351 }
 0xd00   :  { %446 = vrot.lane.b32.xlu1 %v1352_v55, %s1466_s4 }
 0xd72   :  { %v447_v57 = vpop.permute.xlu1 %446 }
 0xd73   :  { %v449_v58 = vmul.f32 %v447_v57, %v432_v49  ;;  %v1773_v49 = vld [vmem:[#allocation2] sm:$0xff] }
 0xd74   :  { %568 = vmatpush.msrb.mxu3 %v1773_v49  ;;  %748 = vmatpush.msrb.mxu0 %v1773_v49 }
 0xd75   :  { %451 = vrot.lane.b32.xlu2 %v449_v58, %s1467_s27  ;;  %569 = vmatmul.f32.vlgmr.msrb.gmra.mxu3 %v544_v51 }
 0xdcf   :  { %v452_v59 = vpop.permute.xlu2 %451 }
 0xdd0   :  { %1300 = vmatmul.msk.f32.vlgmr.msrb.gmra.mxu1 %vm169_vm5, %v452_v59 }
 0xdd1   :  { %644 = vmatpush.msrb.mxu1 %v1696_v30 }
 0xdd3   :  { %645 = vmatpush.msrb.mxu1 %v1698_v31 }
 0xdd5   :  { %646 = vmatpush.msrb.mxu1 %v1702_v32 }
 0xdd7   :  { %647 = vmatpush.msrb.mxu1 %v1706_v33 }
 0xdd9   :  { %648 = vmatpush.msrb.mxu1 %v1712_v35 }
 0xddb   :  { %649 = vmatpush.msrb.mxu1 %v1721_v38 }
 0xddd   :  { %650 = vmatpush.msrb.mxu1 %v1728_v40 }
 0xddf   :  { %651 = vmatpush.msrb.mxu1 %v1733_v41 }
 0xde1   :  { %652 = vmatpush.msrb.mxu1 %v1738_v42 }
 0xde3   :  { %653 = vmatpush.msrb.mxu1 %v1743_v43 }
 0xde5   :  { %654 = vmatpush.msrb.mxu1 %v1748_v44 }
 0xde7   :  { %655 = vmatpush.msrb.mxu1 %v1753_v45 }
 0xde9   :  { %656 = vmatpush.msrb.mxu1 %v1758_v46 }
 0xdeb   :  { %657 = vmatpush.msrb.mxu1 %v1763_v47 }
 0xded   :  { %658 = vmatpush.msrb.mxu1 %v1768_v48 }
 0xdef   :  { %659 = vmatpush.msrb.mxu1 %v1773_v49 }
 0xdf8   :  { %v570_v55 = vpop.f32.mrf.mxu3 }
 0xe4d   :  { %v472_v62 = vpop.f32.mrf.mxu1 }
 0xe4e   :  { %v475_v63 = vadd.f32 %v472_v62, %v164_v61 }
 0xe50   :  { %v476_v0 = vmul.f32 %v475_v63, %v1586_v13 }
 0xe52   :  { %1353 = vtanh.f32 %v476_v0 }
 0xe58   :  { %v1354_v1 = vpop.eup %1353 }
 0xe59   :  { %v478_v2 = vmul.f32 %v1354_v1, %v1586_v13 }
 0xe5b   :  { %v479_v3 = vadd.f32 %v478_v2, %v1589_v18 }
 0xe5d   :  { %482 = vrot.lane.b32.xlu0 %v479_v3, %s1466_s4  ;;  %v480_v6 = vmul.f32 %v479_v3, %v443_v54  ;;  %v1797_v54 = vld [vmem:[%s2071_s6] ss:$0 sm:$0xff] }
 0xe5e   :  { %v571_v56 = vadd.f32 %v1797_v54, %v570_v55 }
 0xecf   :  { %v483_v4 = vpop.permute.xlu0 %482 }
 0xed0   :  { %v485_v5 = vmul.f32 %v483_v4, %v479_v3 }
 0xed2   :  { %487 = vrot.lane.b32.xlu1 %v485_v5, %s1467_s27  ;;  %v1812_v5 = vld [vmem:[%s2072_s7 + $0x18] sm:$0xff] }
 0xed3   :  { %634 = vmatpush.msrb.mxu2 %v1812_v5  ;;  %811 = vmatpush.msra.mxu3 %v1812_v5 }
 0xed4   :  { %900 = vmatpush.msra.mxu0 %v1812_v5 }
 0xf44   :  { %v488_v7 = vpop.permute.xlu1 %487 }
 0xf45   :  { %v490_v8 = vadd.f32 %v488_v7, %v480_v6  ;;  %v1817_v6 = vld [vmem:[%s2072_s7 + $0x10] sm:$0xff]  ;;  %v1824_v7 = vld [vmem:[%s2072_s7 + $0x8] sm:$0xff] }
 0xf46   :  { %635 = vmatpush.msrb.mxu2 %v1817_v6  ;;  %812 = vmatpush.msra.mxu3 %v1817_v6 }
 0xf47   :  { %1355 = vtanh.f32 %v490_v8  ;;  %901 = vmatpush.msra.mxu0 %v1817_v6 }
 0xf48   :  { %636 = vmatpush.msrb.mxu2 %v1824_v7  ;;  %813 = vmatpush.msra.mxu3 %v1824_v7 }
 0xf49   :  { %902 = vmatpush.msra.mxu0 %v1824_v7 }
 0xf4d   :  { %v1356_v10 = vpop.eup %1355 }
 0xf4e   :  { %493 = vrot.lane.b32.xlu2 %v1356_v10, %s1466_s4 }
 0xfa8   :  { %v494_v11 = vpop.permute.xlu2 %493 }
 0xfa9   :  { %v496_v12 = vmul.f32 %v494_v11, %v479_v3 }
 0xfab   :  { %498 = vrot.lane.b32.xlu0 %v496_v12, %s1467_s27 }
0x101d   :  { %v499_v15 = vpop.permute.xlu0 %498 }
0x101e   :  { %1301 = vmatmul.msk.f32.vlgmr.msra.gmra.mxu2 %vm169_vm5, %v499_v15 }
0x10a1   :  { %v519_v19 = vpop.f32.mrf.mxu2 }
0x10a2   :  { %v522_v20 = vadd.f32 %v519_v19, %v167_v17 }
0x10a4   :  { %v523_v21 = vmul.f32 %v522_v20, %v1586_v13 }
0x10a6   :  { %1357 = vtanh.f32 %v523_v21 }
0x10ac   :  { %v1358_v22 = vpop.eup %1357 }
0x10ad   :  { %v525_v23 = vmul.f32 %v1358_v22, %v1586_v13 }
0x10af   :  { %v1688_v24 = vadd.f32 %v525_v23, %v1589_v18 }
0x10b1   :  { %529 = vrot.lane.b32.xlu1 %v1688_v24, %s1466_s4  ;;  %v527_v9 = vmul.f32 %v1688_v24, %v490_v8  ;;  %v1833_v8 = vld [vmem:[%s2072_s7] sm:$0xff] }
0x10b2   :  { %637 = vmatpush.msrb.mxu2 %v1833_v8  ;;  %814 = vmatpush.msra.mxu3 %v1833_v8 }
0x10b3   :  { %903 = vmatpush.msra.mxu0 %v1833_v8 }
0x10b4   :  { %676 = vmatpush.msra.mxu2 %v1709_v34  ;;  %854 = vmatpush.msrb.mxu3 %v1709_v34 }
0x10b6   :  { %677 = vmatpush.msra.mxu2 %v1715_v36  ;;  %855 = vmatpush.msrb.mxu3 %v1715_v36 }
0x10b8   :  { %678 = vmatpush.msra.mxu2 %v1718_v37  ;;  %856 = vmatpush.msrb.mxu3 %v1718_v37 }
0x10ba   :  { %679 = vmatpush.msra.mxu2 %v1725_v39  ;;  %857 = vmatpush.msrb.mxu3 %v1725_v39 }
0x1123   :  { %v530_v25 = vpop.permute.xlu1 %529 }
0x1124   :  { %v532_v26 = vmul.f32 %v530_v25, %v1688_v24 }
0x1126   :  { %534 = vrot.lane.b32.xlu2 %v532_v26, %s1467_s27 }
0x1180   :  { %v535_v27 = vpop.permute.xlu2 %534 }
0x1181   :  { %v537_v28 = vadd.f32 %v535_v27, %v527_v9 }
0x1183   :  { %1359 = vtanh.f32 %v537_v28 }
0x1189   :  { %v1360_v29 = vpop.eup %1359 }
0x118a   :  { %540 = vrot.lane.b32.xlu0 %v1360_v29, %s1466_s4 }
0x11fc   :  { %v541_v50 = vpop.permute.xlu0 %540 }
0x11fd   :  { %v543_v52 = vmul.f32 %v541_v50, %v1688_v24 }
0x11ff   :  { %546 = vrot.lane.b32.xlu1 %v543_v52, %s1467_s27 }
0x1271   :  { %v547_v53 = vpop.permute.xlu1 %546 }
0x1272   :  { %1302 = vmatmul.msk.f32.vlgmr.msra.gmra.mxu1 %vm169_vm5, %v547_v53 }
0x1273   :  { %989 = vmatpush.msra.mxu1 %v1812_v5 }
0x1275   :  { %990 = vmatpush.msra.mxu1 %v1817_v6 }
0x1277   :  { %991 = vmatpush.msra.mxu1 %v1824_v7 }
0x1279   :  { %992 = vmatpush.msra.mxu1 %v1833_v8 }
0x12ef   :  { %v590_v57 = vpop.f32.mrf.mxu1 }
0x12f0   :  { %v591_v58 = vadd.f32 %v590_v57, %v571_v56 }
0x12f2   :  { %v593_v59 = vmul.f32 %v591_v58, %v1586_v13 }
0x12f4   :  { %1361 = vtanh.f32 %v593_v59 }
0x12fa   :  { %v1362_v60 = vpop.eup %1361 }
0x12fb   :  { %v595_v61 = vmul.f32 %v1362_v60, %v1586_v13 }
0x12fd   :  { %v596_v62 = vadd.f32 %v595_v61, %v1589_v18 }
0x12ff   :  { %599 = vrot.lane.b32.xlu2 %v596_v62, %s1466_s4  ;;  %v597_v1 = vmul.f32 0.0, %v596_v62 }
0x1359   :  { %v600_v63 = vpop.permute.xlu2 %599 }
0x135a   :  { %v602_v0 = vmul.f32 %v600_v63, %v596_v62 }
0x135c   :  { %604 = vrot.lane.b32.xlu0 %v602_v0, %s1467_s27 }
0x13ce   :  { %v605_v2 = vpop.permute.xlu0 %604 }
0x13cf   :  { %v1805_v3 = vadd.f32 %v605_v2, %v597_v1 }
0x13d1   :  { %1363 = vtanh.f32 %v1805_v3 }
0x13d7   :  { %v1364_v4 = vpop.eup %1363 }
0x13d8   :  { %610 = vrot.lane.b32.xlu1 %v1364_v4, %s1466_s4 }
0x144a   :  { %v611_v10 = vpop.permute.xlu1 %610 }
0x144b   :  { %v613_v11 = vmul.f32 %v611_v10, %v596_v62 }
0x144d   :  { %618 = vrot.lane.b32.xlu2 %v613_v11, %s1467_s27 }
0x14a7   :  { %v619_v12 = vpop.permute.xlu2 %618 }
0x14a8   :  { %1303 = vmatmul.msk.f32.vlgmr.msrb.gmra.mxu2 %vm169_vm5, %v619_v12 }
0x14a9   :  { %722 = vmatpush.msrb.mxu2 %v1812_v5 }
0x14ab   :  { %723 = vmatpush.msrb.mxu2 %v1817_v6 }
0x14ad   :  { %724 = vmatpush.msrb.mxu2 %v1824_v7 }
0x14af   :  { %725 = vmatpush.msrb.mxu2 %v1833_v8 }
0x14b0   :  { %1304 = vmatmul.msk.f32.vlgmr.msra.gmra.mxu2 %vm169_vm5, %v619_v12 }
0x14b1   :  { %765 = vmatpush.msra.mxu2 %v1709_v34 }
0x14b3   :  { %766 = vmatpush.msra.mxu2 %v1715_v36 }
0x14b5   :  { %767 = vmatpush.msra.mxu2 %v1718_v37 }
0x14b7   :  { %768 = vmatpush.msra.mxu2 %v1725_v39 }
0x152b   :  { %v639_v15 = vpop.f32.mrf.mxu2 }
0x152c   :  { %v640_v16 = vadd.f32 %v1867_v14, %v639_v15 }
0x152e   :  { %1365 = vtanh.f32 %v640_v16 }
0x1533   :  { %v681_v21 = vpop.f32.mrf.mxu2 }
0x1534   :  { %v1366_v17 = vpop.eup %1365 }
0x1535   :  { %643 = vst [vmem:[#allocation5] sm:$0xff] %v1366_v17  ;;  %660 = vmatmul.f32.vlgmr.msrb.gmra.mxu1 %v1366_v17 }
0x1536   :  { %1032 = vmatpush.msrb.mxu1 %v1709_v34 }
0x1538   :  { %1033 = vmatpush.msrb.mxu1 %v1715_v36 }
0x153a   :  { %1034 = vmatpush.msrb.mxu1 %v1718_v37 }
0x153c   :  { %1035 = vmatpush.msrb.mxu1 %v1725_v39 }
0x15b2   :  { %v661_v19 = vpop.f32.mrf.mxu1 }
0x15b3   :  { %v662_v20 = vadd.f32 %v1797_v54, %v661_v19 }
0x15b5   :  { %v682_v22 = vadd.f32 %v681_v21, %v662_v20 }
0x15b7   :  { %v684_v23 = vmul.f32 %v682_v22, %v1586_v13 }
0x15b9   :  { %1367 = vtanh.f32 %v684_v23 }
0x15bf   :  { %v1368_v24 = vpop.eup %1367 }
0x15c0   :  { %v686_v25 = vmul.f32 %v1368_v24, %v1586_v13 }
0x15c2   :  { %v687_v26 = vadd.f32 %v686_v25, %v1589_v18 }
0x15c4   :  { %690 = vrot.lane.b32.xlu0 %v687_v26, %s1466_s4  ;;  %v688_v28 = vmul.f32 %v687_v26, %v1805_v3 }
0x1636   :  { %v691_v9 = vpop.permute.xlu0 %690 }
0x1637   :  { %v693_v27 = vmul.f32 %v691_v9, %v687_v26 }
0x1639   :  { %695 = vrot.lane.b32.xlu1 %v693_v27, %s1467_s27 }
0x16ab   :  { %v696_v29 = vpop.permute.xlu1 %695 }
0x16ac   :  { %v1881_v50 = vadd.f32 %v696_v29, %v688_v28 }
0x16ae   :  { %1369 = vtanh.f32 %v1881_v50 }
0x16b4   :  { %v1370_v51 = vpop.eup %1369 }
0x16b5   :  { %701 = vrot.lane.b32.xlu2 %v1370_v51, %s1466_s4 }
0x170f   :  { %v702_v52 = vpop.permute.xlu2 %701 }
0x1710   :  { %v704_v53 = vmul.f32 %v702_v52, %v687_v26 }
0x1712   :  { %706 = vrot.lane.b32.xlu0 %v704_v53, %s1467_s27 }
0x1784   :  { %v707_v55 = vpop.permute.xlu0 %706 }
0x1785   :  { %1305 = vmatmul.msk.f32.vlgmr.msrb.gmra.mxu2 %vm169_vm5, %v707_v55 }
0x1786   :  { %822 = vmatpush.msrb.mxu2 %v1696_v30 }
0x1788   :  { %823 = vmatpush.msrb.mxu2 %v1698_v31 }
0x178a   :  { %824 = vmatpush.msrb.mxu2 %v1702_v32 }
0x178c   :  { %825 = vmatpush.msrb.mxu2 %v1706_v33 }
0x178d   :  { %1306 = vmatmul.msk.f32.vlgmr.msra.gmra.mxu2 %vm169_vm5, %v707_v55 }
0x178e   :  { %826 = vmatpush.msrb.mxu2 %v1712_v35 }
0x1790   :  { %827 = vmatpush.msrb.mxu2 %v1721_v38 }
0x1792   :  { %828 = vmatpush.msrb.mxu2 %v1728_v40 }
0x1794   :  { %829 = vmatpush.msrb.mxu2 %v1733_v41 }
0x1796   :  { %830 = vmatpush.msrb.mxu2 %v1738_v42 }
0x1798   :  { %831 = vmatpush.msrb.mxu2 %v1743_v43 }
0x179a   :  { %832 = vmatpush.msrb.mxu2 %v1748_v44 }
0x179c   :  { %833 = vmatpush.msrb.mxu2 %v1753_v45 }
0x179e   :  { %834 = vmatpush.msrb.mxu2 %v1758_v46 }
0x17a0   :  { %835 = vmatpush.msrb.mxu2 %v1763_v47 }
0x17a2   :  { %836 = vmatpush.msrb.mxu2 %v1768_v48 }
0x17a4   :  { %837 = vmatpush.msrb.mxu2 %v1773_v49 }
0x17a6   :  { %1089 = vmatpush.msra.mxu2 %v1696_v30 }
0x17a8   :  { %1090 = vmatpush.msra.mxu2 %v1698_v31 }
0x17aa   :  { %1091 = vmatpush.msra.mxu2 %v1702_v32 }
0x17ac   :  { %1092 = vmatpush.msra.mxu2 %v1706_v33 }
0x17ae   :  { %1093 = vmatpush.msra.mxu2 %v1712_v35 }
0x17b0   :  { %1094 = vmatpush.msra.mxu2 %v1721_v38 }
0x17b2   :  { %1095 = vmatpush.msra.mxu2 %v1728_v40 }
0x17b4   :  { %1096 = vmatpush.msra.mxu2 %v1733_v41 }
0x17b6   :  { %1097 = vmatpush.msra.mxu2 %v1738_v42 }
0x17b8   :  { %1098 = vmatpush.msra.mxu2 %v1743_v43 }
0x17ba   :  { %1099 = vmatpush.msra.mxu2 %v1748_v44 }
0x17bc   :  { %1100 = vmatpush.msra.mxu2 %v1753_v45 }
0x17be   :  { %1101 = vmatpush.msra.mxu2 %v1758_v46 }
0x17c0   :  { %1102 = vmatpush.msra.mxu2 %v1763_v47 }
0x17c2   :  { %1103 = vmatpush.msra.mxu2 %v1768_v48 }
0x17c4   :  { %1104 = vmatpush.msra.mxu2 %v1773_v49 }
0x1808   :  { %v727_v56 = vpop.f32.mrf.mxu2 }
0x1809   :  { %v728_v57 = vadd.f32 %v1867_v14, %v727_v56 }
0x180b   :  { %1371 = vtanh.f32 %v728_v57 }
0x1810   :  { %v770_v61 = vpop.f32.mrf.mxu2 }
0x1811   :  { %v1372_v58 = vpop.eup %1371 }
0x1812   :  { %732 = vst [vmem:[#allocation5 + $0x8] sm:$0xff] %v1372_v58  ;;  %749 = vmatmul.f32.vlgmr.msrb.gmra.mxu0 %v1372_v58 }
0x1813   :  { %943 = vmatpush.msrb.mxu0 %v1709_v34 }
0x1815   :  { %944 = vmatpush.msrb.mxu0 %v1715_v36 }
0x1817   :  { %945 = vmatpush.msrb.mxu0 %v1718_v37 }
0x1819   :  { %946 = vmatpush.msrb.mxu0 %v1725_v39 }
0x188f   :  { %v750_v59 = vpop.f32.mrf.mxu0 }
0x1890   :  { %v751_v60 = vadd.f32 %v1797_v54, %v750_v59 }
0x1892   :  { %v771_v62 = vadd.f32 %v770_v61, %v751_v60 }
0x1894   :  { %v773_v63 = vmul.f32 %v771_v62, %v1586_v13 }
0x1896   :  { %1373 = vtanh.f32 %v773_v63 }
0x189c   :  { %v1374_v0 = vpop.eup %1373 }
0x189d   :  { %v775_v1 = vmul.f32 %v1374_v0, %v1586_v13 }
0x189f   :  { %v776_v2 = vadd.f32 %v775_v1, %v1589_v18 }
0x18a1   :  { %779 = vrot.lane.b32.xlu1 %v776_v2, %s1466_s4  ;;  %v777_v10 = vmul.f32 %v776_v2, %v1881_v50 }
0x1913   :  { %v780_v3 = vpop.permute.xlu1 %779 }
0x1914   :  { %v782_v4 = vmul.f32 %v780_v3, %v776_v2 }
0x1916   :  { %784 = vrot.lane.b32.xlu2 %v782_v4, %s1467_s27 }
0x1970   :  { %v785_v11 = vpop.permute.xlu2 %784 }
0x1971   :  { %v787_v12 = vadd.f32 %v785_v11, %v777_v10 }
0x1973   :  { %1375 = vtanh.f32 %v787_v12 }
0x1979   :  { %v1376_v15 = vpop.eup %1375 }
0x197a   :  { %790 = vrot.lane.b32.xlu0 %v1376_v15, %s1466_s4 }
0x19ec   :  { %v791_v16 = vpop.permute.xlu0 %790 }
0x19ed   :  { %v793_v17 = vmul.f32 %v791_v16, %v776_v2 }
0x19ef   :  { %795 = vrot.lane.b32.xlu1 %v793_v17, %s1467_s27 }
0x1a61   :  { %v796_v19 = vpop.permute.xlu1 %795 }
0x1a62   :  { %1307 = vmatmul.msk.f32.vlgmr.msra.gmra.mxu3 %vm169_vm5, %v796_v19 }
0x1a63   :  { %911 = vmatpush.msra.mxu3 %v1696_v30 }
0x1a65   :  { %912 = vmatpush.msra.mxu3 %v1698_v31 }
0x1a67   :  { %913 = vmatpush.msra.mxu3 %v1702_v32 }
0x1a69   :  { %914 = vmatpush.msra.mxu3 %v1706_v33 }
0x1a6a   :  { %1308 = vmatmul.msk.f32.vlgmr.msrb.gmra.mxu3 %vm169_vm5, %v796_v19 }
0x1a6b   :  { %915 = vmatpush.msra.mxu3 %v1712_v35 }
0x1a6d   :  { %916 = vmatpush.msra.mxu3 %v1721_v38 }
0x1a6f   :  { %917 = vmatpush.msra.mxu3 %v1728_v40 }
0x1a71   :  { %918 = vmatpush.msra.mxu3 %v1733_v41 }
0x1a73   :  { %919 = vmatpush.msra.mxu3 %v1738_v42 }
0x1a75   :  { %920 = vmatpush.msra.mxu3 %v1743_v43 }
0x1a77   :  { %921 = vmatpush.msra.mxu3 %v1748_v44 }
0x1a79   :  { %922 = vmatpush.msra.mxu3 %v1753_v45 }
0x1a7b   :  { %923 = vmatpush.msra.mxu3 %v1758_v46 }
0x1a7d   :  { %924 = vmatpush.msra.mxu3 %v1763_v47 }
0x1a7f   :  { %925 = vmatpush.msra.mxu3 %v1768_v48 }
0x1a81   :  { %926 = vmatpush.msra.mxu3 %v1773_v49 }
0x1a83   :  { %1167 = vmatpush.msrb.mxu3 %v1812_v5 }
0x1a85   :  { %1168 = vmatpush.msrb.mxu3 %v1817_v6 }
0x1a87   :  { %1169 = vmatpush.msrb.mxu3 %v1824_v7 }
0x1a89   :  { %1170 = vmatpush.msrb.mxu3 %v1833_v8 }
0x1ae5   :  { %v816_v20 = vpop.f32.mrf.mxu3 }
0x1ae6   :  { %v817_v21 = vadd.f32 %v1867_v14, %v816_v20 }
0x1ae8   :  { %1377 = vtanh.f32 %v817_v21 }
0x1aed   :  { %v859_v25 = vpop.f32.mrf.mxu3 }
0x1aee   :  { %v1378_v22 = vpop.eup %1377 }
0x1aef   :  { %821 = vst [vmem:[#allocation5 + $0x10] sm:$0xff] %v1378_v22  ;;  %838 = vmatmul.f32.vlgmr.msrb.gmra.mxu2 %v1378_v22 }
0x1b72   :  { %v839_v23 = vpop.f32.mrf.mxu2 }
0x1b73   :  { %v840_v24 = vadd.f32 %v1797_v54, %v839_v23 }
0x1b75   :  { %v860_v26 = vadd.f32 %v859_v25, %v840_v24 }
0x1b77   :  { %v862_v9 = vmul.f32 %v860_v26, %v1586_v13 }
0x1b79   :  { %1379 = vtanh.f32 %v862_v9 }
0x1b7f   :  { %v1380_v27 = vpop.eup %1379 }
0x1b80   :  { %v864_v28 = vmul.f32 %v1380_v27, %v1586_v13 }
0x1b82   :  { %v865_v29 = vadd.f32 %v864_v28, %v1589_v18 }
0x1b84   :  { %868 = vrot.lane.b32.xlu2 %v865_v29, %s1466_s4  ;;  %v866_v52 = vmul.f32 %v865_v29, %v787_v12 }
0x1bde   :  { %v869_v50 = vpop.permute.xlu2 %868 }
0x1bdf   :  { %v871_v51 = vmul.f32 %v869_v50, %v865_v29 }
0x1be1   :  { %873 = vrot.lane.b32.xlu0 %v871_v51, %s1467_s27 }
0x1c53   :  { %v874_v53 = vpop.permute.xlu0 %873 }
0x1c54   :  { %v876_v55 = vadd.f32 %v874_v53, %v866_v52 }
0x1c56   :  { %1381 = vtanh.f32 %v876_v55 }
0x1c5c   :  { %v1382_v56 = vpop.eup %1381 }
0x1c5d   :  { %879 = vrot.lane.b32.xlu1 %v1382_v56, %s1466_s4 }
0x1ccf   :  { %v880_v57 = vpop.permute.xlu1 %879 }
0x1cd0   :  { %v882_v58 = vmul.f32 %v880_v57, %v865_v29 }
0x1cd2   :  { %884 = vrot.lane.b32.xlu2 %v882_v58, %s1467_s27 }
0x1d2c   :  { %v885_v59 = vpop.permute.xlu2 %884 }
0x1d2d   :  { %1309 = vmatmul.msk.f32.vlgmr.msra.gmra.mxu0 %vm169_vm5, %v885_v59 }
0x1d2e   :  { %1000 = vmatpush.msra.mxu0 %v1696_v30 }
0x1d30   :  { %1001 = vmatpush.msra.mxu0 %v1698_v31 }
0x1d32   :  { %1002 = vmatpush.msra.mxu0 %v1702_v32 }
0x1d34   :  { %1003 = vmatpush.msra.mxu0 %v1706_v33 }
0x1d35   :  { %1310 = vmatmul.msk.f32.vlgmr.msrb.gmra.mxu0 %vm169_vm5, %v885_v59 }
0x1d36   :  { %1004 = vmatpush.msra.mxu0 %v1712_v35 }
0x1d38   :  { %1005 = vmatpush.msra.mxu0 %v1721_v38 }
0x1d3a   :  { %1006 = vmatpush.msra.mxu0 %v1728_v40 }
0x1d3c   :  { %1007 = vmatpush.msra.mxu0 %v1733_v41 }
0x1d3e   :  { %1008 = vmatpush.msra.mxu0 %v1738_v42 }
0x1d40   :  { %1009 = vmatpush.msra.mxu0 %v1743_v43 }
0x1d42   :  { %1010 = vmatpush.msra.mxu0 %v1748_v44 }
0x1d44   :  { %1011 = vmatpush.msra.mxu0 %v1753_v45 }
0x1d46   :  { %1012 = vmatpush.msra.mxu0 %v1758_v46 }
0x1d48   :  { %1013 = vmatpush.msra.mxu0 %v1763_v47 }
0x1d4a   :  { %1014 = vmatpush.msra.mxu0 %v1768_v48 }
0x1d4c   :  { %1015 = vmatpush.msra.mxu0 %v1773_v49 }
0x1d4e   :  { %1256 = vmatpush.msrb.mxu0 %v1812_v5 }
0x1d50   :  { %1257 = vmatpush.msrb.mxu0 %v1817_v6 }
0x1d52   :  { %1258 = vmatpush.msrb.mxu0 %v1824_v7 }
0x1d54   :  { %1259 = vmatpush.msrb.mxu0 %v1833_v8 }
0x1daa   :  { %v905_v60 = vpop.f32.mrf.mxu0 }
0x1dab   :  { %v906_v61 = vadd.f32 %v1867_v14, %v905_v60 }
0x1dad   :  { %1383 = vtanh.f32 %v906_v61 }
0x1db2   :  { %v948_v1 = vpop.f32.mrf.mxu0 }
0x1db3   :  { %v1384_v62 = vpop.eup %1383 }
0x1db4   :  { %910 = vst [vmem:[#allocation5 + $0x18] sm:$0xff] %v1384_v62  ;;  %927 = vmatmul.f32.vlgmr.msra.gmra.mxu3 %v1384_v62 }
0x1db5   :  { %1210 = vmatpush.msra.mxu3 %v1709_v34 }
0x1db7   :  { %1211 = vmatpush.msra.mxu3 %v1715_v36 }
0x1db9   :  { %1212 = vmatpush.msra.mxu3 %v1718_v37 }
0x1dbb   :  { %1213 = vmatpush.msra.mxu3 %v1725_v39 }
0x1e37   :  { %v928_v63 = vpop.f32.mrf.mxu3 }
0x1e38   :  { %v929_v0 = vadd.f32 %v1797_v54, %v928_v63 }
0x1e3a   :  { %v949_v2 = vadd.f32 %v948_v1, %v929_v0 }
0x1e3c   :  { %v951_v3 = vmul.f32 %v949_v2, %v1586_v13 }
0x1e3e   :  { %1385 = vtanh.f32 %v951_v3 }
0x1e44   :  { %v1386_v4 = vpop.eup %1385 }
0x1e45   :  { %v953_v10 = vmul.f32 %v1386_v4, %v1586_v13 }
0x1e47   :  { %v954_v11 = vadd.f32 %v953_v10, %v1589_v18 }
0x1e49   :  { %957 = vrot.lane.b32.xlu0 %v954_v11, %s1466_s4  ;;  %v955_v16 = vmul.f32 %v954_v11, %v876_v55 }
0x1ebb   :  { %v958_v12 = vpop.permute.xlu0 %957 }
0x1ebc   :  { %v960_v15 = vmul.f32 %v958_v12, %v954_v11 }
0x1ebe   :  { %962 = vrot.lane.b32.xlu1 %v960_v15, %s1467_s27 }
0x1f30   :  { %v963_v17 = vpop.permute.xlu1 %962 }
0x1f31   :  { %v965_v19 = vadd.f32 %v963_v17, %v955_v16 }
0x1f33   :  { %1387 = vtanh.f32 %v965_v19 }
0x1f39   :  { %v1388_v20 = vpop.eup %1387 }
0x1f3a   :  { %968 = vrot.lane.b32.xlu2 %v1388_v20, %s1466_s4 }
0x1f94   :  { %v969_v21 = vpop.permute.xlu2 %968 }
0x1f95   :  { %v971_v22 = vmul.f32 %v969_v21, %v954_v11 }
0x1f97   :  { %973 = vrot.lane.b32.xlu0 %v971_v22, %s1467_s27 }
0x2009   :  { %v974_v23 = vpop.permute.xlu0 %973 }
0x200a   :  { %1311 = vmatmul.msk.f32.vlgmr.msra.gmra.mxu1 %vm169_vm5, %v974_v23 }
0x200b   :  { %1078 = vmatpush.msra.mxu1 %v1812_v5 }
0x200d   :  { %1079 = vmatpush.msra.mxu1 %v1817_v6 }
0x200f   :  { %1080 = vmatpush.msra.mxu1 %v1824_v7 }
0x2011   :  { %1081 = vmatpush.msra.mxu1 %v1833_v8 }
0x2012   :  { %1312 = vmatmul.msk.f32.vlgmr.msrb.gmra.mxu1 %vm169_vm5, %v974_v23 }
0x2013   :  { %1121 = vmatpush.msrb.mxu1 %v1709_v34 }
0x2015   :  { %1122 = vmatpush.msrb.mxu1 %v1715_v36 }
0x2017   :  { %1123 = vmatpush.msrb.mxu1 %v1718_v37 }
0x2019   :  { %1124 = vmatpush.msrb.mxu1 %v1725_v39 }
0x2087   :  { %v994_v24 = vpop.f32.mrf.mxu1 }
0x2088   :  { %v995_v25 = vadd.f32 %v1867_v14, %v994_v24 }
0x208a   :  { %1389 = vtanh.f32 %v995_v25 }
0x208f   :  { %v1037_v8 = vpop.f32.mrf.mxu1 }
0x2090   :  { %v1390_v5 = vpop.eup %1389 }
0x2091   :  { %999 = vst [vmem:[#allocation5 + $0x20] sm:$0xff] %v1390_v5  ;;  %1016 = vmatmul.f32.vlgmr.msra.gmra.mxu0 %v1390_v5 }
0x210e   :  { %v1017_v6 = vpop.f32.mrf.mxu0 }
0x210f   :  { %v1018_v7 = vadd.f32 %v1797_v54, %v1017_v6 }
0x2111   :  { %v1038_v26 = vadd.f32 %v1037_v8, %v1018_v7 }
0x2113   :  { %v1040_v34 = vmul.f32 %v1038_v26, %v1586_v13 }
0x2115   :  { %1391 = vtanh.f32 %v1040_v34 }
0x211b   :  { %v1392_v36 = vpop.eup %1391 }
0x211c   :  { %v1042_v37 = vmul.f32 %v1392_v36, %v1586_v13 }
0x211e   :  { %v1043_v39 = vadd.f32 %v1042_v37, %v1589_v18 }
0x2120   :  { %1046 = vrot.lane.b32.xlu1 %v1043_v39, %s1466_s4  ;;  %v1044_v28 = vmul.f32 %v1043_v39, %v965_v19 }
0x2192   :  { %v1047_v9 = vpop.permute.xlu1 %1046 }
0x2193   :  { %v1049_v27 = vmul.f32 %v1047_v9, %v1043_v39 }
0x2195   :  { %1051 = vrot.lane.b32.xlu2 %v1049_v27, %s1467_s27 }
0x21ef   :  { %v1052_v29 = vpop.permute.xlu2 %1051 }
0x21f0   :  { %v1054_v50 = vadd.f32 %v1052_v29, %v1044_v28 }
0x21f2   :  { %1393 = vtanh.f32 %v1054_v50 }
0x21f8   :  { %v1394_v51 = vpop.eup %1393 }
0x21f9   :  { %1057 = vrot.lane.b32.xlu0 %v1394_v51, %s1466_s4 }
0x226b   :  { %v1058_v52 = vpop.permute.xlu0 %1057 }
0x226c   :  { %v1060_v53 = vmul.f32 %v1058_v52, %v1043_v39 }
0x226e   :  { %1062 = vrot.lane.b32.xlu1 %v1060_v53, %s1467_s27 }
0x22e0   :  { %v1063_v55 = vpop.permute.xlu1 %1062 }
0x22e1   :  { %1313 = vmatmul.msk.f32.vlgmr.msra.gmra.mxu1 %vm169_vm5, %v1063_v55 }
0x22e2   :  { %1178 = vmatpush.msra.mxu1 %v1696_v30 }
0x22e4   :  { %1179 = vmatpush.msra.mxu1 %v1698_v31 }
0x22e6   :  { %1180 = vmatpush.msra.mxu1 %v1702_v32 }
0x22e8   :  { %1181 = vmatpush.msra.mxu1 %v1706_v33 }
0x22e9   :  { %1314 = vmatmul.msk.f32.vlgmr.msrb.gmra.mxu1 %vm169_vm5, %v1063_v55 }
0x22ea   :  { %1182 = vmatpush.msra.mxu1 %v1712_v35 }
0x22ec   :  { %1183 = vmatpush.msra.mxu1 %v1721_v38 }
0x22ee   :  { %1184 = vmatpush.msra.mxu1 %v1728_v40 }
0x22f0   :  { %1185 = vmatpush.msra.mxu1 %v1733_v41 }
0x22f2   :  { %1186 = vmatpush.msra.mxu1 %v1738_v42 }
0x22f4   :  { %1187 = vmatpush.msra.mxu1 %v1743_v43 }
0x22f6   :  { %1188 = vmatpush.msra.mxu1 %v1748_v44 }
0x22f8   :  { %1189 = vmatpush.msra.mxu1 %v1753_v45 }
0x22fa   :  { %1190 = vmatpush.msra.mxu1 %v1758_v46 }
0x22fc   :  { %1191 = vmatpush.msra.mxu1 %v1763_v47 }
0x22fe   :  { %1192 = vmatpush.msra.mxu1 %v1768_v48 }
0x2300   :  { %1193 = vmatpush.msra.mxu1 %v1773_v49 }
0x235e   :  { %v1083_v30 = vpop.f32.mrf.mxu1 }
0x235f   :  { %v1084_v31 = vadd.f32 %v1867_v14, %v1083_v30 }
0x2361   :  { %1395 = vtanh.f32 %v1084_v31 }
0x2366   :  { %v1126_v38 = vpop.f32.mrf.mxu1 }
0x2367   :  { %v1396_v32 = vpop.eup %1395 }
0x2368   :  { %1088 = vst [vmem:[#allocation5 + $0x28] sm:$0xff] %v1396_v32  ;;  %1105 = vmatmul.f32.vlgmr.msra.gmra.mxu2 %v1396_v32 }
0x23eb   :  { %v1106_v33 = vpop.f32.mrf.mxu2 }
0x23ec   :  { %v1107_v35 = vadd.f32 %v1797_v54, %v1106_v33 }
0x23ee   :  { %v1127_v40 = vadd.f32 %v1126_v38, %v1107_v35 }
0x23f0   :  { %v1129_v41 = vmul.f32 %v1127_v40, %v1586_v13 }
0x23f2   :  { %1397 = vtanh.f32 %v1129_v41 }
0x23f8   :  { %v1398_v42 = vpop.eup %1397 }
0x23f9   :  { %v1131_v43 = vmul.f32 %v1398_v42, %v1586_v13 }
0x23fb   :  { %v1132_v44 = vadd.f32 %v1131_v43, %v1589_v18 }
0x23fd   :  { %1135 = vrot.lane.b32.xlu2 %v1132_v44, %s1466_s4  ;;  %v1133_v47 = vmul.f32 %v1132_v44, %v1054_v50 }
0x2457   :  { %v1136_v45 = vpop.permute.xlu2 %1135 }
0x2458   :  { %v1138_v46 = vmul.f32 %v1136_v45, %v1132_v44 }
0x245a   :  { %1140 = vrot.lane.b32.xlu0 %v1138_v46, %s1467_s27 }
0x24cc   :  { %v1141_v48 = vpop.permute.xlu0 %1140 }
0x24cd   :  { %v1143_v49 = vadd.f32 %v1141_v48, %v1133_v47 }
0x24cf   :  { %1399 = vtanh.f32 %v1143_v49 }
0x24d5   :  { %v1400_v56 = vpop.eup %1399 }
0x24d6   :  { %1146 = vrot.lane.b32.xlu1 %v1400_v56, %s1466_s4 }
0x2548   :  { %v1147_v57 = vpop.permute.xlu1 %1146 }
0x2549   :  { %v1149_v58 = vmul.f32 %v1147_v57, %v1132_v44 }
0x254b   :  { %1151 = vrot.lane.b32.xlu2 %v1149_v58, %s1467_s27 }
0x25a5   :  { %v1152_v59 = vpop.permute.xlu2 %1151 }
0x25a6   :  { %1315 = vmatmul.msk.f32.vlgmr.msrb.gmra.mxu3 %vm169_vm5, %v1152_v59 }
0x25ae   :  { %1316 = vmatmul.msk.f32.vlgmr.msra.gmra.mxu3 %vm169_vm5, %v1152_v59 }
0x2629   :  { %v1172_v60 = vpop.f32.mrf.mxu3 }
0x262a   :  { %v1173_v61 = vadd.f32 %v1867_v14, %v1172_v60 }
0x262c   :  { %1401 = vtanh.f32 %v1173_v61 }
0x2631   :  { %v1215_v1 = vpop.f32.mrf.mxu3 }
0x2632   :  { %v1402_v62 = vpop.eup %1401 }
0x2633   :  { %1177 = vst [vmem:[#allocation5 + $0x30] sm:$0xff] %v1402_v62  ;;  %1194 = vmatmul.f32.vlgmr.msra.gmra.mxu1 %v1402_v62 }
0x26b0   :  { %v1195_v63 = vpop.f32.mrf.mxu1 }
0x26b1   :  { %v1196_v0 = vadd.f32 %v1797_v54, %v1195_v63 }
0x26b3   :  { %v1216_v2 = vadd.f32 %v1215_v1, %v1196_v0 }
0x26b5   :  { %v1218_v3 = vmul.f32 %v1216_v2, %v1586_v13 }
0x26b7   :  { %1403 = vtanh.f32 %v1218_v3 }
0x26bd   :  { %v1404_v4 = vpop.eup %1403 }
0x26be   :  { %v1220_v10 = vmul.f32 %v1404_v4, %v1586_v13 }
0x26c0   :  { %v1221_v11 = vadd.f32 %v1220_v10, %v1589_v18 }
0x26c2   :  { %1224 = vrot.lane.b32.xlu0 %v1221_v11, %s1466_s4  ;;  %v1222_v16 = vmul.f32 %v1221_v11, %v1143_v49 }
0x2734   :  { %v1225_v12 = vpop.permute.xlu0 %1224 }
0x2735   :  { %v1227_v15 = vmul.f32 %v1225_v12, %v1221_v11 }
0x2737   :  { %1229 = vrot.lane.b32.xlu1 %v1227_v15, %s1467_s27 }
0x27a9   :  { %v1230_v17 = vpop.permute.xlu1 %1229 }
0x27aa   :  { %v1232_v19 = vadd.f32 %v1230_v17, %v1222_v16 }
0x27ac   :  { %1405 = vtanh.f32 %v1232_v19 }
0x27b2   :  { %v1406_v54 = vpop.eup %1405 }
0x27b3   :  { %1235 = vrot.lane.b32.xlu2 %v1406_v54, %s1466_s4 }
0x280d   :  { %v1236_v20 = vpop.permute.xlu2 %1235 }
0x280e   :  { %v1238_v21 = vmul.f32 %v1236_v20, %v1221_v11 }
0x2810   :  { %1240 = vrot.lane.b32.xlu0 %v1238_v21, %s1467_s27 }
0x2882   :  { %v1241_v13 = vpop.permute.xlu0 %1240 }
0x2883   :  { %1317 = vmatmul.msk.f32.vlgmr.msrb.gmra.mxu0 %vm169_vm5, %v1241_v13 }
0x2900   :  { %v1261_v18 = vpop.f32.mrf.mxu0 }
0x2901   :  { %v1262_v22 = vadd.f32 %v1867_v14, %v1261_v18 }
0x2903   :  { %1407 = vtanh.f32 %v1262_v22 }
0x2909   :  { %v1408_v23 = vpop.eup %1407 }
0x290a   :  { %1266 = vst [vmem:[#allocation5 + $0x38] sm:$0xff] %v1408_v23 }
0x290b   :  { %1279 = dma.vmem_to_hbm [thread:$0]  %s1272_s10, 1024, %s1274_s13, [#allocation4], %s1462_s14, %s1462_s14, %s1463_s15  }
0x290c   :  { %1459 = dma.done.wait [#allocation4], 1024  }
0x290d   :  { %1460 = vsyncadd [#allocation4], 4294966272 }
0x290e   :  { %1284 = vsyncpa [#allocation3], 1 }
0x290f   :  { %1285 = vsyncpa [#allocation4], 1 }

</bundles_post_ra>
